<compile_context>
chip_gen: v6e
topology: v6e:2x2x1
jax: 0.10.0
libtpu: 0.0.40
codegen_flags: <defaults>
</compile_context>

<pallas_src>
import functools

import jax
import jax.numpy as jnp
from jax.experimental import pallas as pl
from jax.experimental.pallas import tpu as pltpu

_LANE = 128


def _round_up(x, m):
    return ((x + m - 1) // m) * m


def _row_tile(rows, cap=1024):
    # >=2 grid steps so v7x's two TensorCores both get work; tile sized from
    # cdiv so the last tile is mostly real rows (padding < 16 rows per tile);
    # capped at 1024 rows so the double-buffered working set stays ~10-12 MiB,
    # comfortably inside v7x's 64 MiB VMEM (and trivially inside v5e/v6e's 128).
    nsteps = max(2, pl.cdiv(rows, cap))
    tile = _round_up(pl.cdiv(rows, nsteps), 16)
    return max(16, min(tile, _round_up(rows, 16)))


def _compiler_params():
    return pltpu.CompilerParams(
        dimension_semantics=("parallel",),   # shard row tiles across v7x's 2 TCs
        vmem_limit_bytes=48 * 1024 * 1024,   # above 16/32 MiB defaults, under v7x physical
    )


# ---------------------------------------------------------------------------
# FastRCNNPredictor: one fused matmul  out = x @ [Wc | Wb | 0pad] + [bc | bb | 0]
# x arrives f32 and is cast to bf16 in-kernel (free VPU cast, no extra HBM pass).
# ---------------------------------------------------------------------------
def _box_head_kernel(x_ref, w_ref, b_ref, o_ref):
    x = x_ref[...].astype(jnp.bfloat16)
    acc = jnp.dot(x, w_ref[...], preferred_element_type=jnp.float32)
    o_ref[...] = (acc + b_ref[...]).astype(o_ref.dtype)


def fast_rcnn_predictor(roi_feats, params, num_classes):
    rows, cin = roi_feats.shape
    wcb = params["wcb"]                      # (cin, npad) bf16
    bcb = params["bcb"]                      # (1, npad)   f32
    npad = wcb.shape[1]

    tile = _row_tile(rows)
    rows_pad = _round_up(rows, tile)
    x = roi_feats                            # keep f32; cast happens in-kernel
    if rows_pad != rows:
        x = jnp.pad(x, ((0, rows_pad - rows), (0, 0)))

    out = pl.pallas_call(
        _box_head_kernel,
        out_shape=jax.ShapeDtypeStruct((rows_pad, npad), jnp.bfloat16),
        grid=(rows_pad // tile,),
        in_specs=[
            pl.BlockSpec((tile, cin), lambda i: (i, 0)),
            pl.BlockSpec((cin, npad), lambda i: (0, 0)),
            pl.BlockSpec((1, npad), lambda i: (0, 0)),
        ],
        out_specs=pl.BlockSpec((tile, npad), lambda i: (i, 0)),
        compiler_params=_compiler_params(),
    )(x, wcb, bcb)

    cls_logits = out[:rows, :num_classes]
    bbox_deltas = out[:rows, num_classes:5 * num_classes]
    return cls_logits, bbox_deltas


# ---------------------------------------------------------------------------
# MaskRCNNPredictor: ConvTranspose2d(Cin, Chid, k=2, s=2) -> ReLU -> Conv2d 1x1
#   h = relu(X @ Wt_cat + bt)          Wt_cat = [Wt(0,0)|Wt(0,1)|Wt(1,0)|Wt(1,1)]
#   out[:, k*Cpad:(k+1)*Cpad] = h[:, k*Chid:(k+1)*Chid] @ W1_pad + b1_pad
# ---------------------------------------------------------------------------
def _mask_head_kernel(x_ref, wt_ref, bt_ref, w1_ref, b1_ref, o_ref):
    # single wide MXU pass over all 4 deconv positions: (tile, Cin) @ (Cin, 4*Chid)
    h = jnp.dot(x_ref[...], wt_ref[...], preferred_element_type=jnp.float32) + bt_ref[...]
    h = jnp.maximum(h, 0.0).astype(jnp.bfloat16)   # epilogue in f32, cast for MXU
    chid = w1_ref.shape[0]
    cpad = w1_ref.shape[1]
    w1 = w1_ref[...]
    b1 = b1_ref[...]
    # NOTE: N=cpad=128 under-fills the 256-wide MXU on v6e/v7x; only worth
    # block-diagonal pairing if a bundle dump shows the MXU slot is binding
    # (at these sizes the kernel is DMA/overhead bound).
    for k in range(4):  # static unroll; 128-aligned lane slices -> unmasked stores
        o_ref[:, k * cpad:(k + 1) * cpad] = (
            jnp.dot(h[:, k * chid:(k + 1) * chid], w1,
                    preferred_element_type=jnp.float32) + b1).astype(o_ref.dtype)


def mask_rcnn_predictor(mask_feats_nchw, params, num_classes):
    n, cin, hh, ww = mask_feats_nchw.shape
    wt = params["wt"]        # (cin, 4*chid) bf16
    bt = params["bt"]        # (1, 4*chid)   f32
    w1 = params["w1"]        # (chid, cpad)  bf16
    b1 = params["b1"]        # (1, cpad)     f32
    four_chid = wt.shape[1]
    chid = w1.shape[0]
    cpad = w1.shape[1]

    rows = n * hh * ww
    # cast BEFORE the NCHW->NHWC transpose so the transpose pass moves bf16 bytes
    x = mask_feats_nchw.astype(jnp.bfloat16)
    x = jnp.transpose(x, (0, 2, 3, 1)).reshape(rows, cin)
    tile = _row_tile(rows)
    rows_pad = _round_up(rows, tile)
    if rows_pad != rows:
        x = jnp.pad(x, ((0, rows_pad - rows), (0, 0)))

    out = pl.pallas_call(
        _mask_head_kernel,
        out_shape=jax.ShapeDtypeStruct((rows_pad, 4 * cpad), jnp.bfloat16),
        grid=(rows_pad // tile,),
        in_specs=[
            pl.BlockSpec((tile, cin), lambda i: (i, 0)),
            pl.BlockSpec((cin, four_chid), lambda i: (0, 0)),
            pl.BlockSpec((1, four_chid), lambda i: (0, 0)),
            pl.BlockSpec((chid, cpad), lambda i: (0, 0)),
            pl.BlockSpec((1, cpad), lambda i: (0, 0)),
        ],
        out_specs=pl.BlockSpec((tile, 4 * cpad), lambda i: (i, 0)),
        compiler_params=_compiler_params(),
    )(x, wt, bt, w1, b1)

    # out col = k*cpad + c with k = ki*2 + kj; deconv scatter out[n,c,2i+ki,2j+kj]
    # (entirely in bf16 now; padded rows are sliced off before the scatter).
    # TODO(synk): if the downstream consumer is layout-agnostic, return NHWC to
    # drop this channel-major permute.
    y = out[:rows].reshape(n, hh, ww, 2, 2, cpad)[..., :num_classes]
    y = jnp.transpose(y, (0, 5, 1, 3, 2, 4)).reshape(n, num_classes, 2 * hh, 2 * ww)
    return y


@functools.partial(jax.jit, static_argnames=("num_classes",))
def _heads_impl(roi_feats, mask_feats, box_params, mask_params, num_classes):
    cls_logits, bbox_deltas = fast_rcnn_predictor(roi_feats, box_params, num_classes)
    mask_logits = mask_rcnn_predictor(mask_feats, mask_params, num_classes)
    return {"cls_logits": cls_logits,
            "bbox_deltas": bbox_deltas,
            "mask_logits": mask_logits}


# ---------------------------------------------------------------------------
# Module wrapper mirroring MaskRCNN.forward's mode handling.
# ---------------------------------------------------------------------------
class MaskRCNNPallas:
    def __init__(self, dictionary, in_features=32, in_features_mask=32,
                 hidden_layer=32, seed=0):
        self.dictionary = dictionary
        self.input_size = [512, 512]
        self.num_classes = len(dictionary)
        self.category = [v for d in dictionary for v in d.keys()]
        self.weight = [d[v] for d in dictionary for v in d.keys() if v in self.category]

        key = jax.random.PRNGKey(seed)
        ks = jax.random.split(key, 4)
        c = self.num_classes

        # --- FastRCNNPredictor params: fused, lane-padded (in_features, pad128(5c))
        # (for COCO's 91 classes npad=512 is already 256-aligned for v6e/v7x MXU)
        npad = _round_up(5 * c, _LANE)
        wc = 0.02 * jax.random.normal(ks[0], (in_features, c), jnp.float32)
        wb = 0.02 * jax.random.normal(ks[1], (in_features, 4 * c), jnp.float32)
        wcb = jnp.zeros((in_features, npad), jnp.float32)
        wcb = wcb.at[:, :c].set(wc).at[:, c:5 * c].set(wb)
        self.box_params = {
            "wcb": wcb.astype(jnp.bfloat16),
            "bcb": jnp.zeros((1, npad), jnp.float32),
        }

        # --- MaskRCNNPredictor params
        # ConvTranspose2d weight (Cin, Chid, 2, 2) -> concat k positions along lanes
        wt_full = 0.02 * jax.random.normal(
            ks[2], (in_features_mask, hidden_layer, 2, 2), jnp.float32)
        wt_cat = jnp.concatenate(
            [wt_full[:, :, ki, kj] for ki in range(2) for kj in range(2)], axis=1)
        bt_cat = jnp.tile(jnp.zeros((hidden_layer,), jnp.float32), 4)[None, :]
        # Conv2d 1x1 weight (C, Chid, 1, 1) -> (Chid, pad128(C))
        w1_full = 0.02 * jax.random.normal(ks[3], (c, hidden_layer, 1, 1), jnp.float32)
        cpad = _round_up(c, _LANE)
        w1 = jnp.zeros((hidden_layer, cpad), jnp.float32)
        w1 = w1.at[:, :c].set(jnp.transpose(w1_full[:, :, 0, 0]))
        self.mask_params = {
            "wt": wt_cat.astype(jnp.bfloat16),    # (Cin, 4*Chid)
            "bt": bt_cat,                         # (1, 4*Chid)
            "w1": w1.astype(jnp.bfloat16),        # (Chid, Cpad)
            "b1": jnp.zeros((1, cpad), jnp.float32),
        }

    def _heads(self, roi_feats, mask_feats):
        return _heads_impl(roi_feats, mask_feats, self.box_params,
                           self.mask_params, self.num_classes)

    def forward(self, roi_feats, mask_feats, targets=None, mode="infer", **kwargs):
        threshold = 0.5  # parity with the reference forward; unused
        if mode == "infer":
            return self._heads(roi_feats, mask_feats)
        elif mode == "val":
            losses = {"loss": 0}
            outputs = self._heads(roi_feats, mask_feats)
            return losses, outputs
        else:
            # TODO(synk): RPN/box/mask matching + training losses are
            # data-dependent torchvision internals with no clean Pallas equivalent.
            outputs = self._heads(roi_feats, mask_feats)
            losses = {"loss_stub": jnp.float32(0.0)}
            losses["loss"] = sum(losses[k] for k in losses if k != "loss")
            return losses


if __name__ == "__main__":
    # small synthetic config: 3-class dictionary
    dictionary = [{"person": 1.0}, {"car": 1.0}, {"dog": 1.0}]

    num_rois = 8
    in_features = 32         # real model: 1024
    in_features_mask = 32    # real model: 256
    hidden_layer = 32        # real model: 256
    mask_hw = 8              # real model: 14 (RoIAlign output for mask head)

    model = MaskRCNNPallas(dictionary, in_features, in_features_mask, hidden_layer)

    key = jax.random.PRNGKey(0)
    k1, k2 = jax.random.split(key)
    roi_feats = jax.random.normal(k1, (num_rois, in_features), jnp.float32)
    mask_feats = jax.random.normal(
        k2, (num_rois, in_features_mask, mask_hw, mask_hw), jnp.float32)

    preds = model.forward(roi_feats, mask_feats, mode="infer")
    preds = jax.block_until_ready(preds)

    c = len(dictionary)
    assert preds["cls_logits"].shape == (num_rois, c)
    assert preds["bbox_deltas"].shape == (num_rois, 4 * c)
    assert preds["mask_logits"].shape == (num_rois, c, 2 * mask_hw, 2 * mask_hw)

    # --- pure-JAX reference (same bf16 rounding of inputs/intermediates) ---
    xb = roi_feats.astype(jnp.bfloat16).astype(jnp.float32)
    ref_box = xb @ model.box_params["wcb"].astype(jnp.float32) + model.box_params["bcb"]
    assert jnp.allclose(preds["cls_logits"].astype(jnp.float32),
                        ref_box[:, :c], atol=2e-2, rtol=2e-2)
    assert jnp.allclose(preds["bbox_deltas"].astype(jnp.float32),
                        ref_box[:, c:5 * c], atol=2e-2, rtol=2e-2)

    xm = jnp.transpose(mask_feats, (0, 2, 3, 1)).reshape(-1, in_features_mask)
    xm = xm.astype(jnp.bfloat16).astype(jnp.float32)
    h_ref = jnp.maximum(
        xm @ model.mask_params["wt"].astype(jnp.float32) + model.mask_params["bt"], 0.0)
    h_ref = h_ref.astype(jnp.bfloat16).astype(jnp.float32)
    w1f = model.mask_params["w1"].astype(jnp.float32)
    outs = [h_ref[:, k * hidden_layer:(k + 1) * hidden_layer] @ w1f
            + model.mask_params["b1"] for k in range(4)]
    y_ref = jnp.stack(outs, axis=1)[:, :, :c]
    y_ref = y_ref.reshape(num_rois, mask_hw, mask_hw, 2, 2, c)
    y_ref = jnp.transpose(y_ref, (0, 5, 1, 3, 2, 4)).reshape(
        num_rois, c, 2 * mask_hw, 2 * mask_hw)
    assert jnp.allclose(preds["mask_logits"].astype(jnp.float32),
                        y_ref, atol=2e-2, rtol=2e-2)

    print("KERNEL_OK")
</pallas_src>

<mosaic_0001>
module attributes {stable_mosaic.version = 11 : i64} {
  func.func @_box_head_kernel(%arg0: i32, %arg1: memref<16x32xf32, #tpu.memory_space<vmem>>, %arg2: memref<32x128xbf16, #tpu.memory_space<vmem>>, %arg3: memref<1x128xf32, #tpu.memory_space<vmem>>, %arg4: memref<16x128xbf16, #tpu.memory_space<vmem>>) attributes {dimension_semantics = [#tpu.dimension_semantics<parallel>], iteration_bounds = array<i64: 1>, scalar_prefetch = 0 : i64, scratch_operands = 0 : i64, tpu.core_type = #tpu.core_type<tc>, window_params = [{transform_indices = @transform_0, window_bounds = array<i64: 16, 32>}, {pipeline_mode = #tpu.pipeline_mode<synchronous>, transform_indices = @transform_1, window_bounds = array<i64: 32, 128>}, {pipeline_mode = #tpu.pipeline_mode<synchronous>, transform_indices = @transform_2, window_bounds = array<i64: 1, 128>}, {transform_indices = @transform_3, window_bounds = array<i64: 16, 128>}]} {
    %c0 = arith.constant 0 : index
    %c0_0 = arith.constant 0 : index
    %0 = vector.load %arg1[%c0, %c0_0] : memref<16x32xf32, #tpu.memory_space<vmem>>, vector<16x32xf32>
    %1 = arith.truncf %0 : vector<16x32xf32> to vector<16x32xbf16>
    %c0_1 = arith.constant 0 : index
    %c0_2 = arith.constant 0 : index
    %2 = vector.load %arg2[%c0_1, %c0_2] : memref<32x128xbf16, #tpu.memory_space<vmem>>, vector<32x128xbf16>
    %cst = arith.constant dense<0.000000e+00> : vector<16x128xf32>
    %3 = tpu.matmul %1, %2, %cst {dimension_numbers = #tpu.dot_dimension_numbers<[1], [0], [0], [1], [0, 0, 1, 1], [], []>} : vector<16x32xbf16>, vector<32x128xbf16>, vector<16x128xf32> -> vector<16x128xf32>
    %c0_3 = arith.constant 0 : index
    %c0_4 = arith.constant 0 : index
    %4 = vector.load %arg3[%c0_3, %c0_4] : memref<1x128xf32, #tpu.memory_space<vmem>>, vector<1x128xf32>
    %5 = vector.broadcast %4 : vector<1x128xf32> to vector<16x128xf32>
    %6 = arith.addf %3, %5 : vector<16x128xf32>
    %7 = arith.truncf %6 : vector<16x128xf32> to vector<16x128xbf16>
    %c0_5 = arith.constant 0 : index
    %c0_6 = arith.constant 0 : index
    %8 = vector.load %arg4[%c0_5, %c0_6] : memref<16x128xbf16, #tpu.memory_space<vmem>>, vector<16x128xbf16>
    tpu.vector_store %arg4[%c0_5, %c0_6], %7 {strides = array<i32>} : memref<16x128xbf16, #tpu.memory_space<vmem>>, vector<16x128xbf16>,
    return
  }
  func.func @transform_0(%arg0: i32) -> (i32, i32) {
    %c0_i32 = arith.constant 0 : i32
    %c0_i32_0 = arith.constant 0 : i32
    return %arg0, %c0_i32 : i32, i32
  }
  func.func @transform_1(%arg0: i32) -> (i32, i32) {
    %c0_i32 = arith.constant 0 : i32
    %c0_i32_0 = arith.constant 0 : i32
    %c0_i32_1 = arith.constant 0 : i32
    return %c0_i32, %c0_i32_0 : i32, i32
  }
  func.func @transform_2(%arg0: i32) -> (i32, i32) {
    %c0_i32 = arith.constant 0 : i32
    %c0_i32_0 = arith.constant 0 : i32
    %c0_i32_1 = arith.constant 0 : i32
    return %c0_i32, %c0_i32_0 : i32, i32
  }
  func.func @transform_3(%arg0: i32) -> (i32, i32) {
    %c0_i32 = arith.constant 0 : i32
    %c0_i32_0 = arith.constant 0 : i32
    return %arg0, %c0_i32 : i32, i32
  }
}

module attributes {stable_mosaic.version = 11 : i64} {
  func.func @_mask_head_kernel(%arg0: i32, %arg1: memref<256x32xbf16, #tpu.memory_space<vmem>>, %arg2: memref<32x128xbf16, #tpu.memory_space<vmem>>, %arg3: memref<1x128xf32, #tpu.memory_space<vmem>>, %arg4: memref<32x128xbf16, #tpu.memory_space<vmem>>, %arg5: memref<1x128xf32, #tpu.memory_space<vmem>>, %arg6: memref<256x512xbf16, #tpu.memory_space<vmem>>) attributes {dimension_semantics = [#tpu.dimension_semantics<parallel>], iteration_bounds = array<i64: 2>, scalar_prefetch = 0 : i64, scratch_operands = 0 : i64, tpu.core_type = #tpu.core_type<tc>, window_params = [{transform_indices = @transform_0, window_bounds = array<i64: 256, 32>}, {pipeline_mode = #tpu.pipeline_mode<synchronous>, transform_indices = @transform_1, window_bounds = array<i64: 32, 128>}, {pipeline_mode = #tpu.pipeline_mode<synchronous>, transform_indices = @transform_2, window_bounds = array<i64: 1, 128>}, {pipeline_mode = #tpu.pipeline_mode<synchronous>, transform_indices = @transform_3, window_bounds = array<i64: 32, 128>}, {pipeline_mode = #tpu.pipeline_mode<synchronous>, transform_indices = @transform_4, window_bounds = array<i64: 1, 128>}, {transform_indices = @transform_5, window_bounds = array<i64: 256, 512>}]} {
    %c0 = arith.constant 0 : index
    %c0_0 = arith.constant 0 : index
    %0 = vector.load %arg1[%c0, %c0_0] : memref<256x32xbf16, #tpu.memory_space<vmem>>, vector<256x32xbf16>
    %c0_1 = arith.constant 0 : index
    %c0_2 = arith.constant 0 : index
    %1 = vector.load %arg2[%c0_1, %c0_2] : memref<32x128xbf16, #tpu.memory_space<vmem>>, vector<32x128xbf16>
    %cst = arith.constant dense<0.000000e+00> : vector<256x128xf32>
    %2 = tpu.matmul %0, %1, %cst {dimension_numbers = #tpu.dot_dimension_numbers<[1], [0], [0], [1], [0, 0, 1, 1], [], []>} : vector<256x32xbf16>, vector<32x128xbf16>, vector<256x128xf32> -> vector<256x128xf32>
    %c0_3 = arith.constant 0 : index
    %c0_4 = arith.constant 0 : index
    %3 = vector.load %arg3[%c0_3, %c0_4] : memref<1x128xf32, #tpu.memory_space<vmem>>, vector<1x128xf32>
    %4 = vector.broadcast %3 : vector<1x128xf32> to vector<256x128xf32>
    %5 = arith.addf %2, %4 : vector<256x128xf32>
    %cst_5 = arith.constant 0.000000e+00 : f32
    %6 = vector.broadcast %cst_5 : f32 to vector<256x128xf32>
    %7 = arith.maximumf %5, %6 : vector<256x128xf32>
    %8 = arith.truncf %7 : vector<256x128xf32> to vector<256x128xbf16>
    %c0_6 = arith.constant 0 : index
    %c0_7 = arith.constant 0 : index
    %9 = vector.load %arg4[%c0_6, %c0_7] : memref<32x128xbf16, #tpu.memory_space<vmem>>, vector<32x128xbf16>
    %c0_8 = arith.constant 0 : index
    %c0_9 = arith.constant 0 : index
    %10 = vector.load %arg5[%c0_8, %c0_9] : memref<1x128xf32, #tpu.memory_space<vmem>>, vector<1x128xf32>
    %11 = vector.extract_strided_slice %8 {offsets = [0, 0], sizes = [256, 32], strides = [1, 1]} : vector<256x128xbf16> to vector<256x32xbf16>
    %cst_10 = arith.constant dense<0.000000e+00> : vector<256x128xf32>
    %12 = tpu.matmul %11, %9, %cst_10 {dimension_numbers = #tpu.dot_dimension_numbers<[1], [0], [0], [1], [0, 0, 1, 1], [], []>} : vector<256x32xbf16>, vector<32x128xbf16>, vector<256x128xf32> -> vector<256x128xf32>
    %13 = vector.broadcast %10 : vector<1x128xf32> to vector<256x128xf32>
    %14 = arith.addf %12, %13 : vector<256x128xf32>
    %15 = arith.truncf %14 : vector<256x128xf32> to vector<256x128xbf16>
    %c0_11 = arith.constant 0 : index
    %c0_12 = arith.constant 0 : index
    %16 = vector.load %arg6[%c0_11, %c0_12] : memref<256x512xbf16, #tpu.memory_space<vmem>>, vector<256x128xbf16>
    tpu.vector_store %arg6[%c0_11, %c0_12], %15 {strides = array<i32>} : memref<256x512xbf16, #tpu.memory_space<vmem>>, vector<256x128xbf16>,
    %17 = vector.extract_strided_slice %8 {offsets = [0, 32], sizes = [256, 32], strides = [1, 1]} : vector<256x128xbf16> to vector<256x32xbf16>
    %cst_13 = arith.constant dense<0.000000e+00> : vector<256x128xf32>
    %18 = tpu.matmul %17, %9, %cst_13 {dimension_numbers = #tpu.dot_dimension_numbers<[1], [0], [0], [1], [0, 0, 1, 1], [], []>} : vector<256x32xbf16>, vector<32x128xbf16>, vector<256x128xf32> -> vector<256x128xf32>
    %19 = vector.broadcast %10 : vector<1x128xf32> to vector<256x128xf32>
    %20 = arith.addf %18, %19 : vector<256x128xf32>
    %21 = arith.truncf %20 : vector<256x128xf32> to vector<256x128xbf16>
    %c0_14 = arith.constant 0 : index
    %c128 = arith.constant 128 : index
    %22 = vector.load %arg6[%c0_14, %c128] : memref<256x512xbf16, #tpu.memory_space<vmem>>, vector<256x128xbf16>
    tpu.vector_store %arg6[%c0_14, %c128], %21 {strides = array<i32>} : memref<256x512xbf16, #tpu.memory_space<vmem>>, vector<256x128xbf16>,
    %23 = vector.extract_strided_slice %8 {offsets = [0, 64], sizes = [256, 32], strides = [1, 1]} : vector<256x128xbf16> to vector<256x32xbf16>
    %cst_15 = arith.constant dense<0.000000e+00> : vector<256x128xf32>
    %24 = tpu.matmul %23, %9, %cst_15 {dimension_numbers = #tpu.dot_dimension_numbers<[1], [0], [0], [1], [0, 0, 1, 1], [], []>} : vector<256x32xbf16>, vector<32x128xbf16>, vector<256x128xf32> -> vector<256x128xf32>
    %25 = vector.broadcast %10 : vector<1x128xf32> to vector<256x128xf32>
    %26 = arith.addf %24, %25 : vector<256x128xf32>
    %27 = arith.truncf %26 : vector<256x128xf32> to vector<256x128xbf16>
    %c0_16 = arith.constant 0 : index
    %c256 = arith.constant 256 : index
    %28 = vector.load %arg6[%c0_16, %c256] : memref<256x512xbf16, #tpu.memory_space<vmem>>, vector<256x128xbf16>
    tpu.vector_store %arg6[%c0_16, %c256], %27 {strides = array<i32>} : memref<256x512xbf16, #tpu.memory_space<vmem>>, vector<256x128xbf16>,
    %29 = vector.extract_strided_slice %8 {offsets = [0, 96], sizes = [256, 32], strides = [1, 1]} : vector<256x128xbf16> to vector<256x32xbf16>
    %cst_17 = arith.constant dense<0.000000e+00> : vector<256x128xf32>
    %30 = tpu.matmul %29, %9, %cst_17 {dimension_numbers = #tpu.dot_dimension_numbers<[1], [0], [0], [1], [0, 0, 1, 1], [], []>} : vector<256x32xbf16>, vector<32x128xbf16>, vector<256x128xf32> -> vector<256x128xf32>
    %31 = vector.broadcast %10 : vector<1x128xf32> to vector<256x128xf32>
    %32 = arith.addf %30, %31 : vector<256x128xf32>
    %33 = arith.truncf %32 : vector<256x128xf32> to vector<256x128xbf16>
    %c0_18 = arith.constant 0 : index
    %c384 = arith.constant 384 : index
    %34 = vector.load %arg6[%c0_18, %c384] : memref<256x512xbf16, #tpu.memory_space<vmem>>, vector<256x128xbf16>
    tpu.vector_store %arg6[%c0_18, %c384], %33 {strides = array<i32>} : memref<256x512xbf16, #tpu.memory_space<vmem>>, vector<256x128xbf16>,
    return
  }
  func.func @transform_0(%arg0: i32) -> (i32, i32) {
    %c0_i32 = arith.constant 0 : i32
    %c0_i32_0 = arith.constant 0 : i32
    return %arg0, %c0_i32 : i32, i32
  }
  func.func @transform_1(%arg0: i32) -> (i32, i32) {
    %c0_i32 = arith.constant 0 : i32
    %c0_i32_0 = arith.constant 0 : i32
    %c0_i32_1 = arith.constant 0 : i32
    return %c0_i32, %c0_i32_0 : i32, i32
  }
  func.func @transform_2(%arg0: i32) -> (i32, i32) {
    %c0_i32 = arith.constant 0 : i32
    %c0_i32_0 = arith.constant 0 : i32
    %c0_i32_1 = arith.constant 0 : i32
    return %c0_i32, %c0_i32_0 : i32, i32
  }
  func.func @transform_3(%arg0: i32) -> (i32, i32) {
    %c0_i32 = arith.constant 0 : i32
    %c0_i32_0 = arith.constant 0 : i32
    %c0_i32_1 = arith.constant 0 : i32
    return %c0_i32, %c0_i32_0 : i32, i32
  }
  func.func @transform_4(%arg0: i32) -> (i32, i32) {
    %c0_i32 = arith.constant 0 : i32
    %c0_i32_0 = arith.constant 0 : i32
    %c0_i32_1 = arith.constant 0 : i32
    return %c0_i32, %c0_i32_0 : i32, i32
  }
  func.func @transform_5(%arg0: i32) -> (i32, i32) {
    %c0_i32 = arith.constant 0 : i32
    %c0_i32_0 = arith.constant 0 : i32
    return %arg0, %c0_i32 : i32, i32
  }
}

</mosaic_0001>

<bundles_post_ra>
// kernel: _heads_impl.2
= control target key start
LH: loop header
LB: loop body
LE: loop exit
PB: predicated region body
PF: predicated region fallthrough
CT: control target
= control target key end

     0   :  { %v128_v0 = vmov 0.0   ;;  %vm129_vm0 = vmmov 0   ;;  %vm41_vm1 = vcmask 261120   ;;  %s168_s1 = inlined_call_operand.vmem [shape: bf16[32,128], index: 1, kind: input, shape index: {}]   ;;  %s169_s0 = inlined_call_operand.vmem [shape: f32[16,32], index: 0, kind: input, shape index: {}]   ;;  %s170_s2 = inlined_call_operand.vmem [shape: f32[1,128], index: 2, kind: input, shape index: {}]   ;;  %s171_s3 = inlined_call_operand.vmem [shape: bf16[16,128], index: 3, kind: output, shape index: {}]  }
   0x1   :  { %116 = vmatprep.subr.bf16.mxu0 %v128_v0  ;;  %v126_v1 = vld [vmem:[%s168_s1 + $0x8] sm:$0xff]   ;;  %120 = vmatprep.mubr.msk.bf16.mxu0 %vm129_vm0, %v128_v0  ;;  %v127_v2 = vld [vmem:[%s168_s1] sm:$0xff]  }
   0x2   :  { %117 = vmatpush3.bf16.msra.mxu0 %v126_v1  ;;  %v15_v3 = vld [vmem:[%s169_s0] sm:$0xff]  ;;  %v16_v4 = vld [vmem:[%s169_s0 + $0x8] sm:$0xff] }
   0x3   :  { %118 = vmatprep.subr.bf16.mxu0 %v128_v0  ;;  %v17_v5 = vpack.c.bf16 %v16_v4, %v15_v3  ;;  %v100_v7 = vld [vmem:[%s170_s2] ss:$0 sm:$0xff] }
   0x6   :  { %119 = vmatpush3.bf16.msra.mxu0 %v127_v2 }
   0x9   :  { %121 = vmatmul.mubr.msk.bf16.vlgmr.msra.gmra.mxu0 %vm41_vm1, %v17_v5 }
  0xc9   :  { %v79_v6 = vpop.f32.mrf.mxu0 }
  0xca   :  { %v80_v10 = vadd.f32 %v100_v7, %v79_v6 }
  0xcb   :  { %v122_v8 = vpop.f32.mrf.mxu0 }
  0xcd   :  { %v82_v9 = vpop.f32.mrf.mxu0 }
  0xce   :  { %v83_v11 = vadd.f32 %v100_v7, %v82_v9 }
  0xcf   :  { %v123_v12 = vpop.f32.mrf.mxu0 }
  0xd0   :  { %v111_v13 = vpack.c.bf16 %v83_v11, %v80_v10 }
  0xd2   :  { %112 = vst [vmem:[%s171_s3] sm:$0xff] %v111_v13  }

// kernel: _heads_impl.3
= control target key start
LH: loop header
LB: loop body
LE: loop exit
PB: predicated region body
PF: predicated region fallthrough
CT: control target
= control target key end

     0   :  { %s3011_s18 = smov 0   ;;  %s3552_s0 = inlined_call_operand.vmem [shape: bf16[512,32], index: 0, kind: input, shape index: {}]   ;;  %s3553_s1 = inlined_call_operand.vmem [shape: bf16[32,128], index: 1, kind: input, shape index: {}]   ;;  %s3554_s2 = inlined_call_operand.vmem [shape: f32[1,128], index: 2, kind: input, shape index: {}]   ;;  %s3555_s3 = inlined_call_operand.vmem [shape: bf16[32,128], index: 3, kind: input, shape index: {}]   ;;  %s3556_s4 = inlined_call_operand.vmem [shape: f32[1,128], index: 4, kind: input, shape index: {}]   ;;  %s3557_s5 = inlined_call_operand.vmem [shape: bf16[512,512], index: 5, kind: output, shape index: {}]  }
   0x1 LB: > { %s2293_s19 = sadd.s32 4294967295, %s2976_s18   ;;  %p2297_p0 = scmp.ge.s32.totalorder %s2976_s18, 1  ;;  %s2976_s18 = sphi %s3011_s18, %s15_s18  }
   0x2   : > { %p188_p1 = scmp.lt.s32.totalorder %s2976_s18, 3 }
   0x4   : > { %p189_p2 = pnand %p2297_p0, %p188_p1 }
   0x5   : > { %s2298_s22 = sshll.u32 (!%p189_p2), %s2293_s19, 5  ;;  %s2978_s10 = smov (!%p189_p2), 96  }
   0x6   : > { %192 = sbr.rel (%p189_p2) target bundleno = 668 (0x29c), region = 40  ;;  %p218_p3 = scmp.lt.s32.totalorder (!%p189_p2), %s2298_s22, 63 }
   0x7   : > { %s2979_s11 = smov (!%p189_p2), 32   ;;  %s2980_s12 = smov (!%p189_p2), 64  }
   0xb   : > { %v2949_v0 = vld [vmem:[%s3553_s1 + $0x8] sm:$0xff]   ;;  %v2950_v1 = vld [vmem:[%s3553_s1] sm:$0xff]   ;;  %s3559_s22 = smov (!%p218_p3, %s2298_s22), 63  ;;  %vm366_vm0 = vcmask 261120  }
   0xc   : > { %2754 = vmatprep.subr.bf16.mxu0 %v2949_v0  ;;  %2934 = vmatprep.subr.bf16.mxu1 %v2949_v0  ;;  %s2299_s25 = sshll.u32 %s3559_s22, 2  ;;  %v3068_v18 = vld [vmem:[%s3555_s3 + $0x8] sm:$0xff]   ;;  %v3077_v19 = vld [vmem:[%s3555_s3] sm:$0xff]   ;;  %s2535_s15 = sshll.u32 %s3559_s22, 4 }
   0xd   : > { %2755 = vmatpush3.bf16.msra.mxu0 %v2949_v0  ;;  %2936 = vmatpush3.bf16.msra.mxu1 %v2949_v0  ;;  %s3031_s28 = scalar_lea.vmem %s3552_s0, %s2299_s25  ;;  %v3088_v22 = vld [vmem:[%s3554_s2] ss:$0 sm:$0xff]  ;;  %s3280_s19 = scalar_lea.vmem %s3557_s5, %s2535_s15 }
   0xe   : > { %2756 = vmatprep.subr.bf16.mxu0 %v2950_v1  ;;  %2935 = vmatprep.subr.bf16.mxu1 %v2950_v1  ;;  %v2951_v2 = vld [vmem:[%s3031_s28] sm:$0xff]   ;;  %v2952_v3 = vld [vmem:[%s3031_s28 + $0x8] sm:$0xff]   ;;  %v2953_v4 = vld [vmem:[%s3031_s28 + $0x10] sm:$0xff]  }
   0xf   : > { %2758 = vmatprep.mubr.msk.bf16.mxu0 %vm366_vm0, %v2951_v2  ;;  %v2956_v5 = vld [vmem:[%s3031_s28 + $0x40] sm:$0xff]   ;;  %v2954_v6 = vld [vmem:[%s3031_s28 + $0x18] sm:$0xff]   ;;  %v2958_v7 = vld [vmem:[%s3031_s28 + $0x48] sm:$0xff]  }
  0x10   : > { %2774 = vmatprep.mubr.msk.bf16.mxu1 %vm366_vm0, %v2956_v5  ;;  %v2955_v8 = vld [vmem:[%s3031_s28 + $0x20] sm:$0xff]   ;;  %v2960_v9 = vld [vmem:[%s3031_s28 + $0x50] sm:$0xff]   ;;  %v2962_v10 = vld [vmem:[%s3031_s28 + $0x58] sm:$0xff]  }
  0x11   : > { %2757 = vmatpush3.bf16.msra.mxu0 %v2950_v1  ;;  %2937 = vmatpush3.bf16.msra.mxu1 %v2950_v1  ;;  %v2963_v11 = vld [vmem:[%s3031_s28 + $0x60] sm:$0xff]   ;;  %v2957_v12 = vld [vmem:[%s3031_s28 + $0x28] sm:$0xff]   ;;  %v2959_v13 = vld [vmem:[%s3031_s28 + $0x30] sm:$0xff]  }
  0x12   : > { %v2964_v14 = vld [vmem:[%s3031_s28 + $0x68] sm:$0xff]   ;;  %v2965_v15 = vld [vmem:[%s3031_s28 + $0x70] sm:$0xff]   ;;  %v2961_v16 = vld [vmem:[%s3031_s28 + $0x38] sm:$0xff]   ;;  %2790 = vmatprep.subr.bf16.mxu1 %v3068_v18  ;;  %2826 = vmatprep.subr.bf16.mxu0 %v3068_v18 }
  0x13   : > { %v2966_v17 = vld [vmem:[%s3031_s28 + $0x78] sm:$0xff]  }
  0x14   : > { %2759 = vmatmul.mubr.msk.bf16.vlgmr.msra.gmra.mxu0 %vm366_vm0, %v2952_v3  ;;  %2775 = vmatmul.mubr.msk.bf16.vlgmr.msra.gmra.mxu1 %vm366_vm0, %v2958_v7 }
  0x15   : > { %2762 = vmatprep.mubr.msk.bf16.mxu0 %vm366_vm0, %v2953_v4  ;;  %2778 = vmatprep.mubr.msk.bf16.mxu1 %vm366_vm0, %v2960_v9 }
  0x16   : > { %2791 = vmatpush3.bf16.msra.mxu1 %v3068_v18  ;;  %2827 = vmatpush3.bf16.msra.mxu0 %v3068_v18 }
  0x17   : > { %2792 = vmatprep.subr.bf16.mxu1 %v3077_v19  ;;  %2828 = vmatprep.subr.bf16.mxu0 %v3077_v19 }
  0x1a   : > { %2793 = vmatpush3.bf16.msra.mxu1 %v3077_v19  ;;  %2829 = vmatpush3.bf16.msra.mxu0 %v3077_v19 }
  0x1b   : > { %2862 = vmatprep.subr.bf16.mxu1 %v3068_v18  ;;  %2898 = vmatprep.subr.bf16.mxu0 %v3068_v18 }
  0x1c   : > { %2763 = vmatmul.mubr.msk.bf16.gmra.mxu0 %vm366_vm0, %v2954_v6  ;;  %2779 = vmatmul.mubr.msk.bf16.gmra.mxu1 %vm366_vm0, %v2962_v10 }
  0x1d   : > { %2766 = vmatprep.mubr.msk.bf16.mxu0 %vm366_vm0, %v2955_v8  ;;  %2782 = vmatprep.mubr.msk.bf16.mxu1 %vm366_vm0, %v2963_v11 }
  0x24   : > { %2767 = vmatmul.mubr.msk.bf16.gmra.mxu0 %vm366_vm0, %v2957_v12  ;;  %2783 = vmatmul.mubr.msk.bf16.gmra.mxu1 %vm366_vm0, %v2964_v14 }
  0x25   : > { %2770 = vmatprep.mubr.msk.bf16.mxu0 %vm366_vm0, %v2959_v13  ;;  %2786 = vmatprep.mubr.msk.bf16.mxu1 %vm366_vm0, %v2965_v15 }
  0x2c   : > { %2771 = vmatmul.mubr.msk.bf16.gmra.mxu0 %vm366_vm0, %v2961_v16  ;;  %2787 = vmatmul.mubr.msk.bf16.gmra.mxu1 %vm366_vm0, %v2966_v17 }
  0xd4   : > { %v2760_v20 = vpop.f32.mrf.mxu0  ;;  %v2776_v28 = vpop.f32.mrf.mxu1 }
  0xd5   : > { %v458_v26 = vadd.f32 %v2760_v20, %v3088_v22  ;;  %v522_v11 = vadd.f32 %v2776_v28, %v3088_v22 }
  0xd6   : > { %v449_v21 = vpop.f32.mrf.mxu0  ;;  %v513_v32 = vpop.f32.mrf.mxu1 }
  0xd7   : > { %v450_v24 = vadd.f32 %v3088_v22, %v449_v21  ;;  %v578_v35 = vmax.f32 %v458_v26, 0.0  ;;  %v514_v15 = vadd.f32 %v3088_v22, %v513_v32 }
  0xd8   : > { %v2761_v23 = vpop.f32.mrf.mxu0  ;;  %v2777_v37 = vpop.f32.mrf.mxu1 }
  0xd9   : > { %v461_v25 = vadd.f32 %v2761_v23, %v3088_v22  ;;  %v576_v33 = vmax.f32 %v450_v24, 0.0  ;;  %v525_v13 = vadd.f32 %v2777_v37, %v3088_v22 }
  0xda   : > { %v452_v27 = vpop.f32.mrf.mxu0  ;;  %v516_v41 = vpop.f32.mrf.mxu1 }
  0xdb   : > { %v453_v29 = vadd.f32 %v3088_v22, %v452_v27  ;;  %v579_v30 = vmax.f32 %v461_v25, 0.0  ;;  %v517_v16 = vadd.f32 %v3088_v22, %v516_v41 }
  0xdc   : > { %v2764_v31 = vpop.f32.mrf.mxu0  ;;  %v2780_v46 = vpop.f32.mrf.mxu1 }
  0xdd   : > { %v577_v34 = vmax.f32 %v453_v29, 0.0  ;;  %v3096_v39 = vpack.c.bf16 %v579_v30, %v578_v35  ;;  %v474_v44 = vadd.f32 %v2764_v31, %v3088_v22  ;;  %v538_v25 = vadd.f32 %v2780_v46, %v3088_v22 }
  0xde   : > { %v465_v36 = vpop.f32.mrf.mxu0  ;;  %v529_v50 = vpop.f32.mrf.mxu1  ;;  %v594_v29 = vmax.f32 %v522_v11, 0.0  ;;  %v595_v30 = vmax.f32 %v525_v13, 0.0 }
  0xdf   : > { %v3094_v38 = vpack.c.bf16 %v577_v34, %v576_v33  ;;  %v466_v42 = vadd.f32 %v3088_v22, %v465_v36  ;;  %v582_v53 = vmax.f32 %v474_v44, 0.0  ;;  %v592_v33 = vmax.f32 %v514_v15, 0.0 }
  0xe0   : > { %v2765_v40 = vpop.f32.mrf.mxu0  ;;  %v2781_v55 = vpop.f32.mrf.mxu1  ;;  %v593_v34 = vmax.f32 %v517_v16, 0.0  ;;  %v530_v35 = vadd.f32 %v3088_v22, %v529_v50  ;;  %v3155_v46 = vpack.c.bf16 %v595_v30, %v594_v29 }
  0xe1   : > { %v477_v43 = vadd.f32 %v2765_v40, %v3088_v22  ;;  %1032 = vrot.lane.b32.xlu0 %v3094_v38, %s2978_s10  ;;  %2794 = vmatprep.mubr.msk.bf16.mxu1 %vm366_vm0, %v3094_v38  ;;  %v580_v51 = vmax.f32 %v466_v42, 0.0  ;;  %v541_v26 = vadd.f32 %v2781_v55, %v3088_v22 }
  0xe2   : > { %v468_v45 = vpop.f32.mrf.mxu0  ;;  %2795 = vmatmul.mubr.msk.bf16.vlgmr.msra.gmra.mxu1 %vm366_vm0, %v3096_v39  ;;  %v532_v60 = vpop.f32.mrf.mxu1  ;;  %v616_v50 = vpack.c.bf16 %v593_v34, %v592_v33 }
  0xe3   : > { %v469_v47 = vadd.f32 %v3088_v22, %v468_v45  ;;  %2863 = vmatpush3.bf16.msra.mxu1 %v3068_v18  ;;  %v583_v48 = vmax.f32 %v477_v43, 0.0  ;;  %v533_v36 = vadd.f32 %v3088_v22, %v532_v60  ;;  %v598_v43 = vmax.f32 %v538_v25, 0.0 }
  0xe4   : > { %v2768_v49 = vpop.f32.mrf.mxu0  ;;  %2864 = vmatprep.subr.bf16.mxu1 %v3077_v19  ;;  %v2784_v0 = vpop.f32.mrf.mxu1  ;;  %v599_v44 = vmax.f32 %v541_v26, 0.0 }
  0xe5   : > { %v581_v52 = vmax.f32 %v469_v47, 0.0  ;;  %1034 = vrot.lane.b32.xlu0 %v3096_v39, %s2978_s10  ;;  %v490_v57 = vadd.f32 %v2768_v49, %v3088_v22  ;;  %v3116_v58 = vpack.c.bf16 %v583_v48, %v582_v53  ;;  %v554_v48 = vadd.f32 %v2784_v0, %v3088_v22 }
  0xe6   : > { %v481_v54 = vpop.f32.mrf.mxu0  ;;  %v545_v5 = vpop.f32.mrf.mxu1  ;;  %v619_v55 = vpack.c.bf16 %v599_v44, %v598_v43  ;;  %v3272_v43 = vld [vmem:[%s3556_s4] ss:$0 sm:$0xff] }
  0xe7   : > { %v3112_v56 = vpack.c.bf16 %v581_v52, %v580_v51  ;;  %2865 = vmatpush3.bf16.msra.mxu1 %v3077_v19  ;;  %v482_v61 = vadd.f32 %v3088_v22, %v481_v54  ;;  %v586_v1 = vmax.f32 %v490_v57, 0.0  ;;  %v596_v51 = vmax.f32 %v530_v35, 0.0 }
  0xe8   : > { %v2769_v59 = vpop.f32.mrf.mxu0  ;;  %v2785_v10 = vpop.f32.mrf.mxu1  ;;  %v597_v52 = vmax.f32 %v533_v36, 0.0  ;;  %v546_v53 = vadd.f32 %v3088_v22, %v545_v5 }
  0xe9   : > { %v493_v62 = vadd.f32 %v2769_v59, %v3088_v22  ;;  %1036 = vrot.lane.b32.xlu1 %v3112_v56, %s2978_s10  ;;  %2798 = vmatprep.mubr.msk.bf16.mxu1 %vm366_vm0, %v3112_v56  ;;  %v584_v6 = vmax.f32 %v482_v61, 0.0  ;;  %v557_v49 = vadd.f32 %v2785_v10, %v3088_v22  ;;  %v602_v59 = vmax.f32 %v554_v48, 0.0 }
  0xea   : > { %v484_v63 = vpop.f32.mrf.mxu0  ;;  %2799 = vmatmul.mubr.msk.bf16.gmra.mxu1 %vm366_vm0, %v3116_v58  ;;  %v548_v20 = vpop.f32.mrf.mxu1  ;;  %v600_v0 = vmax.f32 %v546_v53, 0.0 }
  0xeb   : > { %v587_v2 = vmax.f32 %v493_v62, 0.0  ;;  %v485_v3 = vadd.f32 %v3088_v22, %v484_v63  ;;  %v549_v54 = vadd.f32 %v3088_v22, %v548_v20  ;;  %v603_v60 = vmax.f32 %v557_v49, 0.0 }
  0xec   : > { %v2772_v4 = vpop.f32.mrf.mxu0  ;;  %v2788_v28 = vpop.f32.mrf.mxu1  ;;  %v618_v63 = vpack.c.bf16 %v597_v52, %v596_v51 }
  0xed   : > { %v585_v7 = vmax.f32 %v485_v3, 0.0  ;;  %v506_v8 = vadd.f32 %v2772_v4, %v3088_v22  ;;  %1038 = vrot.lane.b32.xlu1 %v3116_v58, %s2978_s10  ;;  %v3131_v12 = vpack.c.bf16 %v587_v2, %v586_v1  ;;  %v570_v61 = vadd.f32 %v2788_v28, %v3088_v22 }
  0xee   : > { %v497_v9 = vpop.f32.mrf.mxu0  ;;  %v561_v37 = vpop.f32.mrf.mxu1  ;;  %v601_v1 = vmax.f32 %v549_v54, 0.0  ;;  %v621_v4 = vpack.c.bf16 %v603_v60, %v602_v59 }
  0xef   : > { %v3134_v14 = vpack.c.bf16 %v585_v7, %v584_v6  ;;  %v590_v21 = vmax.f32 %v506_v8, 0.0  ;;  %v498_v23 = vadd.f32 %v3088_v22, %v497_v9  ;;  %v562_v2 = vadd.f32 %v3088_v22, %v561_v37 }
  0xf0   : > { %v2773_v17 = vpop.f32.mrf.mxu0  ;;  %v2789_v45 = vpop.f32.mrf.mxu1  ;;  %v606_v5 = vmax.f32 %v570_v61, 0.0  ;;  %v620_v7 = vpack.c.bf16 %v601_v1, %v600_v0 }
  0xf1   : > { %v509_v24 = vadd.f32 %v2773_v17, %v3088_v22  ;;  %1042 = vrot.lane.b32.xlu1 %v3131_v12, %s2978_s10  ;;  %1040 = vrot.lane.b32.xlu0 %v3134_v14, %s2978_s10  ;;  %v588_v40 = vmax.f32 %v498_v23, 0.0  ;;  %v573_v62 = vadd.f32 %v2789_v45, %v3088_v22  ;;  %v604_v8 = vmax.f32 %v562_v2, 0.0 }
  0xf2   : > { %2802 = vmatprep.mubr.msk.bf16.mxu1 %vm366_vm0, %v3134_v14  ;;  %v500_v27 = vpop.f32.mrf.mxu0  ;;  %v564_v57 = vpop.f32.mrf.mxu1 }
  0xf3   : > { %v591_v31 = vmax.f32 %v509_v24, 0.0  ;;  %v501_v32 = vadd.f32 %v3088_v22, %v500_v27  ;;  %2803 = vmatmul.mubr.msk.bf16.gmra.mxu1 %vm366_vm0, %v3131_v12  ;;  %v565_v3 = vadd.f32 %v3088_v22, %v564_v57  ;;  %v607_v6 = vmax.f32 %v573_v62, 0.0 }
  0xf5   : > { %v3153_v41 = vpack.c.bf16 %v591_v31, %v590_v21  ;;  %v589_v42 = vmax.f32 %v501_v32, 0.0  ;;  %v605_v9 = vmax.f32 %v565_v3, 0.0  ;;  %v623_v10 = vpack.c.bf16 %v607_v6, %v606_v5 }
  0xf7   : > { %v614_v47 = vpack.c.bf16 %v589_v42, %v588_v40  ;;  %1046 = vrot.lane.b32.xlu1 %v3153_v41, %s2978_s10  ;;  %v622_v11 = vpack.c.bf16 %v605_v9, %v604_v8 }
  0xf9   : > { %1044 = vrot.lane.b32.xlu0 %v614_v47, %s2978_s10  ;;  %2806 = vmatprep.mubr.msk.bf16.mxu1 %vm366_vm0, %v614_v47 }
  0xfb   : > { %2807 = vmatmul.mubr.msk.bf16.gmra.mxu1 %vm366_vm0, %v3153_v41  ;;  %1050 = vrot.lane.b32.xlu1 %v3155_v46, %s2978_s10 }
  0xfc   : > { %2810 = vmatprep.mubr.msk.bf16.mxu1 %vm366_vm0, %v616_v50 }
  0xfd   : > { %1048 = vrot.lane.b32.xlu0 %v616_v50, %s2978_s10 }
  0xff   : > { %1054 = vrot.lane.b32.xlu1 %v619_v55, %s2978_s10 }
 0x101   : > { %1052 = vrot.lane.b32.xlu0 %v618_v63, %s2978_s10 }
 0x103   : > { %2811 = vmatmul.mubr.msk.bf16.gmra.mxu1 %vm366_vm0, %v3155_v46  ;;  %1058 = vrot.lane.b32.xlu1 %v621_v4, %s2978_s10 }
 0x104   : > { %2814 = vmatprep.mubr.msk.bf16.mxu1 %vm366_vm0, %v618_v63 }
 0x105   : > { %1056 = vrot.lane.b32.xlu0 %v620_v7, %s2978_s10 }
 0x107   : > { %1062 = vrot.lane.b32.xlu1 %v623_v10, %s2978_s10 }
 0x109   : > { %1060 = vrot.lane.b32.xlu0 %v622_v11, %s2978_s10 }
 0x10b   : > { %2815 = vmatmul.mubr.msk.bf16.gmra.mxu1 %vm366_vm0, %v619_v55  ;;  %1834 = vrot.lane.b32.xlu1 %v3094_v38, %s2979_s11 }
 0x10c   : > { %2818 = vmatprep.mubr.msk.bf16.mxu1 %vm366_vm0, %v620_v7 }
 0x10d   : > { %1433 = vrot.lane.b32.xlu0 %v3094_v38, %s2980_s12 }
 0x10f   : > { %1836 = vrot.lane.b32.xlu1 %v3096_v39, %s2979_s11 }
 0x111   : > { %1435 = vrot.lane.b32.xlu0 %v3096_v39, %s2980_s12 }
 0x113   : > { %2819 = vmatmul.mubr.msk.bf16.gmra.mxu1 %vm366_vm0, %v621_v4  ;;  %1838 = vrot.lane.b32.xlu1 %v3112_v56, %s2979_s11 }
 0x114   : > { %2822 = vmatprep.mubr.msk.bf16.mxu1 %vm366_vm0, %v622_v11 }
 0x115   : > { %1437 = vrot.lane.b32.xlu0 %v3112_v56, %s2980_s12 }
 0x117   : > { %1840 = vrot.lane.b32.xlu1 %v3116_v58, %s2979_s11 }
 0x119   : > { %1439 = vrot.lane.b32.xlu0 %v3116_v58, %s2980_s12 }
 0x11b   : > { %2823 = vmatmul.mubr.msk.bf16.gmra.mxu1 %vm366_vm0, %v623_v10  ;;  %1842 = vrot.lane.b32.xlu1 %v3134_v14, %s2979_s11 }
 0x11d   : > { %1441 = vrot.lane.b32.xlu0 %v3134_v14, %s2980_s12 }
 0x11f   : > { %1844 = vrot.lane.b32.xlu1 %v3131_v12, %s2979_s11 }
 0x121   : > { %1443 = vrot.lane.b32.xlu0 %v3131_v12, %s2980_s12 }
 0x123   : > { %1846 = vrot.lane.b32.xlu1 %v614_v47, %s2979_s11 }
 0x125   : > { %1445 = vrot.lane.b32.xlu0 %v614_v47, %s2980_s12 }
 0x127   : > { %1848 = vrot.lane.b32.xlu1 %v3153_v41, %s2979_s11 }
 0x129   : > { %1447 = vrot.lane.b32.xlu0 %v3153_v41, %s2980_s12 }
 0x12b   : > { %1850 = vrot.lane.b32.xlu1 %v616_v50, %s2979_s11 }
 0x12d   : > { %1449 = vrot.lane.b32.xlu0 %v616_v50, %s2980_s12 }
 0x12f   : > { %1852 = vrot.lane.b32.xlu1 %v3155_v46, %s2979_s11 }
 0x131   : > { %1451 = vrot.lane.b32.xlu0 %v3155_v46, %s2980_s12 }
 0x133   : > { %1854 = vrot.lane.b32.xlu1 %v618_v63, %s2979_s11 }
 0x135   : > { %1453 = vrot.lane.b32.xlu0 %v618_v63, %s2980_s12 }
 0x137   : > { %1856 = vrot.lane.b32.xlu1 %v619_v55, %s2979_s11 }
 0x139   : > { %1455 = vrot.lane.b32.xlu0 %v619_v55, %s2980_s12 }
 0x13b   : > { %1858 = vrot.lane.b32.xlu1 %v620_v7, %s2979_s11 }
 0x13d   : > { %1457 = vrot.lane.b32.xlu0 %v620_v7, %s2980_s12 }
 0x13f   : > { %1860 = vrot.lane.b32.xlu1 %v621_v4, %s2979_s11 }
 0x141   : > { %1459 = vrot.lane.b32.xlu0 %v621_v4, %s2980_s12 }
 0x143   : > { %1862 = vrot.lane.b32.xlu1 %v622_v11, %s2979_s11 }
 0x145   : > { %1461 = vrot.lane.b32.xlu0 %v622_v11, %s2980_s12 }
 0x147   : > { %1864 = vrot.lane.b32.xlu1 %v623_v10, %s2979_s11 }
 0x149   : > { %1463 = vrot.lane.b32.xlu0 %v623_v10, %s2980_s12 }
 0x153   : > { %v1033_v22 = vpop.permute.xlu0 %1032 }
 0x154   : > { %2830 = vmatprep.mubr.msk.bf16.mxu0 %vm366_vm0, %v1033_v22 }
 0x157   : > { %v1035_v38 = vpop.permute.xlu0 %1034 }
 0x158   : > { %2831 = vmatmul.mubr.msk.bf16.vlgmr.msra.gmra.mxu0 %vm366_vm0, %v1035_v38 }
 0x159   : > { %2899 = vmatpush3.bf16.msra.mxu0 %v3068_v18 }
 0x15a   : > { %2900 = vmatprep.subr.bf16.mxu0 %v3077_v19 }
 0x15b   : > { %v1037_v39 = vpop.permute.xlu1 %1036 }
 0x15c   : > { %2834 = vmatprep.mubr.msk.bf16.mxu0 %vm366_vm0, %v1037_v39 }
 0x15d   : > { %2901 = vmatpush3.bf16.msra.mxu0 %v3077_v19 }
 0x15f   : > { %v1039_v56 = vpop.permute.xlu1 %1038 }
 0x160   : > { %2835 = vmatmul.mubr.msk.bf16.gmra.mxu0 %vm366_vm0, %v1039_v56 }
 0x163   : > { %v1041_v58 = vpop.permute.xlu0 %1040  ;;  %v1043_v12 = vpop.permute.xlu1 %1042 }
 0x164   : > { %2838 = vmatprep.mubr.msk.bf16.mxu0 %vm366_vm0, %v1041_v58 }
 0x168   : > { %2839 = vmatmul.mubr.msk.bf16.gmra.mxu0 %vm366_vm0, %v1043_v12 }
 0x169   : > { %v1047_v13 = vpop.permute.xlu1 %1046 }
 0x16b   : > { %v1045_v14 = vpop.permute.xlu0 %1044 }
 0x16c   : > { %2842 = vmatprep.mubr.msk.bf16.mxu0 %vm366_vm0, %v1045_v14 }
 0x16d   : > { %v1051_v18 = vpop.permute.xlu1 %1050 }
 0x16f   : > { %v1049_v15 = vpop.permute.xlu0 %1048 }
 0x170   : > { %2843 = vmatmul.mubr.msk.bf16.gmra.mxu0 %vm366_vm0, %v1047_v13 }
 0x171   : > { %v1055_v16 = vpop.permute.xlu1 %1054  ;;  %2846 = vmatprep.mubr.msk.bf16.mxu0 %vm366_vm0, %v1049_v15 }
 0x173   : > { %v1053_v19 = vpop.permute.xlu0 %1052 }
 0x175   : > { %v1059_v17 = vpop.permute.xlu1 %1058 }
 0x177   : > { %v1057_v20 = vpop.permute.xlu0 %1056 }
 0x178   : > { %2847 = vmatmul.mubr.msk.bf16.gmra.mxu0 %vm366_vm0, %v1051_v18 }
 0x179   : > { %v1063_v21 = vpop.permute.xlu1 %1062  ;;  %2850 = vmatprep.mubr.msk.bf16.mxu0 %vm366_vm0, %v1053_v19 }
 0x17b   : > { %v1061_v23 = vpop.permute.xlu0 %1060 }
 0x17d   : > { %v1835_v24 = vpop.permute.xlu1 %1834 }
 0x17f   : > { %v1434_v25 = vpop.permute.xlu0 %1433 }
 0x180   : > { %2851 = vmatmul.mubr.msk.bf16.gmra.mxu0 %vm366_vm0, %v1055_v16  ;;  %2866 = vmatprep.mubr.msk.bf16.mxu1 %vm366_vm0, %v1434_v25 }
 0x181   : > { %v1837_v26 = vpop.permute.xlu1 %1836  ;;  %2854 = vmatprep.mubr.msk.bf16.mxu0 %vm366_vm0, %v1057_v20 }
 0x183   : > { %v1436_v27 = vpop.permute.xlu0 %1435 }
 0x184   : > { %2867 = vmatmul.mubr.msk.bf16.vlgmr.msra.gmra.mxu1 %vm366_vm0, %v1436_v27 }
 0x185   : > { %v1839_v28 = vpop.permute.xlu1 %1838 }
 0x187   : > { %v1438_v29 = vpop.permute.xlu0 %1437 }
 0x188   : > { %2855 = vmatmul.mubr.msk.bf16.gmra.mxu0 %vm366_vm0, %v1059_v17  ;;  %2870 = vmatprep.mubr.msk.bf16.mxu1 %vm366_vm0, %v1438_v29 }
 0x189   : > { %v1841_v30 = vpop.permute.xlu1 %1840  ;;  %2858 = vmatprep.mubr.msk.bf16.mxu0 %vm366_vm0, %v1061_v23 }
 0x18b   : > { %v1440_v31 = vpop.permute.xlu0 %1439 }
 0x18c   : > { %2871 = vmatmul.mubr.msk.bf16.gmra.mxu1 %vm366_vm0, %v1440_v31 }
 0x18d   : > { %v1843_v32 = vpop.permute.xlu1 %1842 }
 0x18f   : > { %v1442_v33 = vpop.permute.xlu0 %1441 }
 0x190   : > { %2859 = vmatmul.mubr.msk.bf16.gmra.mxu0 %vm366_vm0, %v1063_v21  ;;  %2874 = vmatprep.mubr.msk.bf16.mxu1 %vm366_vm0, %v1442_v33 }
 0x191   : > { %2902 = vmatprep.mubr.msk.bf16.mxu0 %vm366_vm0, %v1835_v24  ;;  %v1845_v34 = vpop.permute.xlu1 %1844 }
 0x193   : > { %v1444_v35 = vpop.permute.xlu0 %1443 }
 0x194   : > { %2875 = vmatmul.mubr.msk.bf16.gmra.mxu1 %vm366_vm0, %v1444_v35 }
 0x195   : > { %v1847_v37 = vpop.permute.xlu1 %1846 }
 0x197   : > { %v1446_v36 = vpop.permute.xlu0 %1445 }
 0x198   : > { %2878 = vmatprep.mubr.msk.bf16.mxu1 %vm366_vm0, %v1446_v36  ;;  %2903 = vmatmul.mubr.msk.bf16.vlgmr.msra.gmra.mxu0 %vm366_vm0, %v1837_v26 }
 0x199   : > { %2906 = vmatprep.mubr.msk.bf16.mxu0 %vm366_vm0, %v1839_v28  ;;  %v1849_v41 = vpop.permute.xlu1 %1848 }
 0x19b   : > { %v1448_v40 = vpop.permute.xlu0 %1447 }
 0x19c   : > { %2879 = vmatmul.mubr.msk.bf16.gmra.mxu1 %vm366_vm0, %v1448_v40 }
 0x19d   : > { %v1851_v47 = vpop.permute.xlu1 %1850 }
 0x19f   : > { %v1450_v42 = vpop.permute.xlu0 %1449 }
 0x1a0   : > { %2882 = vmatprep.mubr.msk.bf16.mxu1 %vm366_vm0, %v1450_v42  ;;  %2907 = vmatmul.mubr.msk.bf16.gmra.mxu0 %vm366_vm0, %v1841_v30 }
 0x1a1   : > { %2910 = vmatprep.mubr.msk.bf16.mxu0 %vm366_vm0, %v1843_v32  ;;  %v1853_v60 = vpop.permute.xlu1 %1852 }
 0x1a2   : > { %v2796_v44 = vpop.f32.mrf.mxu1 }
 0x1a3   : > { %v738_v45 = vadd.f32 %v2796_v44, %v3272_v43  ;;  %v1452_v46 = vpop.permute.xlu0 %1451 }
 0x1a4   : > { %v729_v48 = vpop.f32.mrf.mxu1  ;;  %2883 = vmatmul.mubr.msk.bf16.gmra.mxu1 %vm366_vm0, %v1452_v46 }
 0x1a5   : > { %v2538_v49 = vpack.c.bf16 %v738_v45, %v738_v45  ;;  %v730_v50 = vadd.f32 %v3272_v43, %v729_v48  ;;  %v1855_v8 = vpop.permute.xlu1 %1854 }
 0x1a6   : > { %v2797_v51 = vpop.f32.mrf.mxu1 }
 0x1a7   : > { %986 = vst [vmem:[%s3280_s19 + $0x20] sm:$0xf] %v2538_v49  ;;  %v2536_v52 = vpack.c.bf16 %v730_v50, %v730_v50  ;;  %v741_v53 = vadd.f32 %v2797_v51, %v3272_v43  ;;  %v1454_v54 = vpop.permute.xlu0 %1453 }
 0x1a8   : > { %v732_v55 = vpop.f32.mrf.mxu1  ;;  %2886 = vmatprep.mubr.msk.bf16.mxu1 %vm366_vm0, %v1454_v54  ;;  %2911 = vmatmul.mubr.msk.bf16.gmra.mxu0 %vm366_vm0, %v1845_v34 }
 0x1a9   : > { %984 = vst [vmem:[%s3280_s19] sm:$0xf] %v2536_v52  ;;  %v2539_v57 = vpack.c.bf16 %v741_v53, %v741_v53  ;;  %v733_v59 = vadd.f32 %v3272_v43, %v732_v55  ;;  %2914 = vmatprep.mubr.msk.bf16.mxu0 %vm366_vm0, %v1847_v37  ;;  %v1857_v12 = vpop.permute.xlu1 %1856 }
 0x1aa   : > { %v2800_v61 = vpop.f32.mrf.mxu1 }
 0x1ab   : > { %987 = vst [vmem:[%s3280_s19 + $0x30] sm:$0xf] %v2539_v57  ;;  %v2537_v62 = vpack.c.bf16 %v733_v59, %v733_v59  ;;  %v754_v63 = vadd.f32 %v2800_v61, %v3272_v43  ;;  %v1456_v0 = vpop.permute.xlu0 %1455 }
 0x1ac   : > { %v745_v1 = vpop.f32.mrf.mxu1  ;;  %2887 = vmatmul.mubr.msk.bf16.gmra.mxu1 %vm366_vm0, %v1456_v0 }
 0x1ad   : > { %985 = vst [vmem:[%s3280_s19 + $0x10] sm:$0xf] %v2537_v62  ;;  %v2542_v2 = vpack.c.bf16 %v754_v63, %v754_v63  ;;  %v746_v3 = vadd.f32 %v3272_v43, %v745_v1  ;;  %v1859_v25 = vpop.permute.xlu1 %1858 }
 0x1ae   : > { %v2801_v4 = vpop.f32.mrf.mxu1 }
 0x1af   : > { %990 = vst [vmem:[%s3280_s19 + $0x60] sm:$0xf] %v2542_v2  ;;  %v2540_v5 = vpack.c.bf16 %v746_v3, %v746_v3  ;;  %v757_v6 = vadd.f32 %v2801_v4, %v3272_v43  ;;  %v1458_v7 = vpop.permute.xlu0 %1457 }
 0x1b0   : > { %v748_v9 = vpop.f32.mrf.mxu1  ;;  %2890 = vmatprep.mubr.msk.bf16.mxu1 %vm366_vm0, %v1458_v7  ;;  %2915 = vmatmul.mubr.msk.bf16.gmra.mxu0 %vm366_vm0, %v1849_v41 }
 0x1b1   : > { %988 = vst [vmem:[%s3280_s19 + $0x40] sm:$0xf] %v2540_v5  ;;  %v2543_v10 = vpack.c.bf16 %v757_v6, %v757_v6  ;;  %v749_v11 = vadd.f32 %v3272_v43, %v748_v9  ;;  %2918 = vmatprep.mubr.msk.bf16.mxu0 %vm366_vm0, %v1851_v47  ;;  %v1861_v35 = vpop.permute.xlu1 %1860 }
 0x1b3   : > { %991 = vst [vmem:[%s3280_s19 + $0x70] sm:$0xf] %v2543_v10  ;;  %v2541_v22 = vpack.c.bf16 %v749_v11, %v749_v11  ;;  %v2804_v38 = vpop.f32.mrf.mxu1  ;;  %v1460_v39 = vpop.permute.xlu0 %1459 }
 0x1b4   : > { %v770_v56 = vadd.f32 %v2804_v38, %v3272_v43  ;;  %2891 = vmatmul.mubr.msk.bf16.gmra.mxu1 %vm366_vm0, %v1460_v39 }
 0x1b5   : > { %989 = vst [vmem:[%s3280_s19 + $0x50] sm:$0xf] %v2541_v22  ;;  %v761_v58 = vpop.f32.mrf.mxu1  ;;  %v1863_v48 = vpop.permute.xlu1 %1862 }
 0x1b6   : > { %v2546_v13 = vpack.c.bf16 %v770_v56, %v770_v56  ;;  %v762_v14 = vadd.f32 %v3272_v43, %v761_v58 }
 0x1b7   : > { %v2805_v18 = vpop.f32.mrf.mxu1  ;;  %v1462_v15 = vpop.permute.xlu0 %1461 }
 0x1b8   : > { %994 = vst [vmem:[%s3280_s19 + $0xa0] sm:$0xf] %v2546_v13  ;;  %v2544_v16 = vpack.c.bf16 %v762_v14, %v762_v14  ;;  %v773_v19 = vadd.f32 %v2805_v18, %v3272_v43  ;;  %2894 = vmatprep.mubr.msk.bf16.mxu1 %vm366_vm0, %v1462_v15  ;;  %2919 = vmatmul.mubr.msk.bf16.gmra.mxu0 %vm366_vm0, %v1853_v60 }
 0x1b9   : > { %v764_v17 = vpop.f32.mrf.mxu1  ;;  %2922 = vmatprep.mubr.msk.bf16.mxu0 %vm366_vm0, %v1855_v8  ;;  %v1865_v62 = vpop.permute.xlu1 %1864 }
 0x1ba   : > { %992 = vst [vmem:[%s3280_s19 + $0x80] sm:$0xf] %v2544_v16  ;;  %v2547_v20 = vpack.c.bf16 %v773_v19, %v773_v19  ;;  %v765_v21 = vadd.f32 %v3272_v43, %v764_v17 }
 0x1bb   : > { %v2808_v23 = vpop.f32.mrf.mxu1  ;;  %v1464_v24 = vpop.permute.xlu0 %1463 }
 0x1bc   : > { %995 = vst [vmem:[%s3280_s19 + $0xb0] sm:$0xf] %v2547_v20  ;;  %v2545_v26 = vpack.c.bf16 %v765_v21, %v765_v21  ;;  %v786_v27 = vadd.f32 %v2808_v23, %v3272_v43  ;;  %2895 = vmatmul.mubr.msk.bf16.gmra.mxu1 %vm366_vm0, %v1464_v24 }
 0x1bd   : > { %v777_v28 = vpop.f32.mrf.mxu1 }
 0x1be   : > { %993 = vst [vmem:[%s3280_s19 + $0x90] sm:$0xf] %v2545_v26  ;;  %v2550_v29 = vpack.c.bf16 %v786_v27, %v786_v27  ;;  %v778_v30 = vadd.f32 %v3272_v43, %v777_v28 }
 0x1bf   : > { %v2809_v31 = vpop.f32.mrf.mxu1 }
 0x1c0   : > { %998 = vst [vmem:[%s3280_s19 + $0xe0] sm:$0xf] %v2550_v29  ;;  %v2548_v32 = vpack.c.bf16 %v778_v30, %v778_v30  ;;  %v789_v33 = vadd.f32 %v2809_v31, %v3272_v43  ;;  %2923 = vmatmul.mubr.msk.bf16.gmra.mxu0 %vm366_vm0, %v1857_v12 }
 0x1c1   : > { %v780_v34 = vpop.f32.mrf.mxu1  ;;  %2926 = vmatprep.mubr.msk.bf16.mxu0 %vm366_vm0, %v1859_v25 }
 0x1c2   : > { %996 = vst [vmem:[%s3280_s19 + $0xc0] sm:$0xf] %v2548_v32  ;;  %v2551_v36 = vpack.c.bf16 %v789_v33, %v789_v33  ;;  %v781_v37 = vadd.f32 %v3272_v43, %v780_v34 }
 0x1c3   : > { %v2812_v40 = vpop.f32.mrf.mxu1 }
 0x1c4   : > { %999 = vst [vmem:[%s3280_s19 + $0xf0] sm:$0xf] %v2551_v36  ;;  %v2549_v41 = vpack.c.bf16 %v781_v37, %v781_v37  ;;  %v802_v42 = vadd.f32 %v2812_v40, %v3272_v43 }
 0x1c5   : > { %v793_v44 = vpop.f32.mrf.mxu1 }
 0x1c6   : > { %997 = vst [vmem:[%s3280_s19 + $0xd0] sm:$0xf] %v2549_v41  ;;  %v2554_v45 = vpack.c.bf16 %v802_v42, %v802_v42  ;;  %v794_v46 = vadd.f32 %v3272_v43, %v793_v44 }
 0x1c7   : > { %v2813_v47 = vpop.f32.mrf.mxu1 }
 0x1c8   : > { %1002 = vst [vmem:[%s3280_s19 + $0x120] sm:$0xf] %v2554_v45  ;;  %v2552_v49 = vpack.c.bf16 %v794_v46, %v794_v46  ;;  %v805_v50 = vadd.f32 %v2813_v47, %v3272_v43  ;;  %2927 = vmatmul.mubr.msk.bf16.gmra.mxu0 %vm366_vm0, %v1861_v35 }
 0x1c9   : > { %v796_v51 = vpop.f32.mrf.mxu1  ;;  %2930 = vmatprep.mubr.msk.bf16.mxu0 %vm366_vm0, %v1863_v48 }
 0x1ca   : > { %1000 = vst [vmem:[%s3280_s19 + $0x100] sm:$0xf] %v2552_v49  ;;  %v2555_v52 = vpack.c.bf16 %v805_v50, %v805_v50  ;;  %v797_v53 = vadd.f32 %v3272_v43, %v796_v51 }
 0x1cb   : > { %v2816_v54 = vpop.f32.mrf.mxu1 }
 0x1cc   : > { %1003 = vst [vmem:[%s3280_s19 + $0x130] sm:$0xf] %v2555_v52  ;;  %v2553_v55 = vpack.c.bf16 %v797_v53, %v797_v53  ;;  %v818_v57 = vadd.f32 %v2816_v54, %v3272_v43 }
 0x1cd   : > { %v809_v59 = vpop.f32.mrf.mxu1 }
 0x1ce   : > { %1001 = vst [vmem:[%s3280_s19 + $0x110] sm:$0xf] %v2553_v55  ;;  %v2558_v60 = vpack.c.bf16 %v818_v57, %v818_v57  ;;  %v810_v61 = vadd.f32 %v3272_v43, %v809_v59 }
 0x1cf   : > { %v2817_v63 = vpop.f32.mrf.mxu1 }
 0x1d0   : > { %1006 = vst [vmem:[%s3280_s19 + $0x160] sm:$0xf] %v2558_v60  ;;  %v2556_v0 = vpack.c.bf16 %v810_v61, %v810_v61  ;;  %v821_v1 = vadd.f32 %v2817_v63, %v3272_v43  ;;  %2931 = vmatmul.mubr.msk.bf16.gmra.mxu0 %vm366_vm0, %v1865_v62 }
 0x1d1   : > { %v812_v2 = vpop.f32.mrf.mxu1 }
 0x1d2   : > { %1004 = vst [vmem:[%s3280_s19 + $0x140] sm:$0xf] %v2556_v0  ;;  %v2559_v3 = vpack.c.bf16 %v821_v1, %v821_v1  ;;  %v813_v4 = vadd.f32 %v3272_v43, %v812_v2 }
 0x1d3   : > { %v2820_v5 = vpop.f32.mrf.mxu1 }
 0x1d4   : > { %1007 = vst [vmem:[%s3280_s19 + $0x170] sm:$0xf] %v2559_v3  ;;  %v2557_v6 = vpack.c.bf16 %v813_v4, %v813_v4  ;;  %v834_v7 = vadd.f32 %v2820_v5, %v3272_v43 }
 0x1d5   : > { %v825_v8 = vpop.f32.mrf.mxu1 }
 0x1d6   : > { %1005 = vst [vmem:[%s3280_s19 + $0x150] sm:$0xf] %v2557_v6  ;;  %v2562_v9 = vpack.c.bf16 %v834_v7, %v834_v7  ;;  %v826_v10 = vadd.f32 %v3272_v43, %v825_v8 }
 0x1d7   : > { %v2821_v11 = vpop.f32.mrf.mxu1 }
 0x1d8   : > { %1010 = vst [vmem:[%s3280_s19 + $0x1a0] sm:$0xf] %v2562_v9  ;;  %v2560_v22 = vpack.c.bf16 %v826_v10, %v826_v10  ;;  %v837_v38 = vadd.f32 %v2821_v11, %v3272_v43 }
 0x1d9   : > { %v828_v39 = vpop.f32.mrf.mxu1 }
 0x1da   : > { %1008 = vst [vmem:[%s3280_s19 + $0x180] sm:$0xf] %v2560_v22  ;;  %v2563_v56 = vpack.c.bf16 %v837_v38, %v837_v38  ;;  %v829_v58 = vadd.f32 %v3272_v43, %v828_v39 }
 0x1db   : > { %v2824_v12 = vpop.f32.mrf.mxu1 }
 0x1dc   : > { %1011 = vst [vmem:[%s3280_s19 + $0x1b0] sm:$0xf] %v2563_v56  ;;  %v2561_v13 = vpack.c.bf16 %v829_v58, %v829_v58  ;;  %v850_v14 = vadd.f32 %v2824_v12, %v3272_v43 }
 0x1dd   : > { %v841_v18 = vpop.f32.mrf.mxu1 }
 0x1de   : > { %1009 = vst [vmem:[%s3280_s19 + $0x190] sm:$0xf] %v2561_v13  ;;  %v2566_v15 = vpack.c.bf16 %v850_v14, %v850_v14  ;;  %v842_v16 = vadd.f32 %v3272_v43, %v841_v18 }
 0x1df   : > { %v2825_v19 = vpop.f32.mrf.mxu1 }
 0x1e0   : > { %1014 = vst [vmem:[%s3280_s19 + $0x1e0] sm:$0xf] %v2566_v15  ;;  %v2564_v17 = vpack.c.bf16 %v842_v16, %v842_v16  ;;  %v853_v20 = vadd.f32 %v2825_v19, %v3272_v43 }
 0x1e1   : > { %v844_v21 = vpop.f32.mrf.mxu1 }
 0x1e2   : > { %1012 = vst [vmem:[%s3280_s19 + $0x1c0] sm:$0xf] %v2564_v17  ;;  %v2567_v23 = vpack.c.bf16 %v853_v20, %v853_v20  ;;  %v845_v24 = vadd.f32 %v3272_v43, %v844_v21 }
 0x1e4   : > { %1015 = vst [vmem:[%s3280_s19 + $0x1f0] sm:$0xf] %v2567_v23  ;;  %v2565_v25 = vpack.c.bf16 %v845_v24, %v845_v24 }
 0x1e6   : > { %1013 = vst [vmem:[%s3280_s19 + $0x1d0] sm:$0xf] %v2565_v25 }
 0x218   : > { %v2832_v26 = vpop.f32.mrf.mxu0 }
 0x219   : > { %v1155_v27 = vadd.f32 %v2832_v26, %v3272_v43 }
 0x21a   : > { %v1146_v28 = vpop.f32.mrf.mxu0 }
 0x21b   : > { %v2570_v29 = vpack.c.bf16 %v1155_v27, %v1155_v27  ;;  %v1147_v30 = vadd.f32 %v3272_v43, %v1146_v28 }
 0x21c   : > { %v2833_v31 = vpop.f32.mrf.mxu0 }
 0x21d   : > { %1403 = vst [vmem:[%s3280_s19 + $0x24] sm:$0xf] %v2570_v29  ;;  %v2568_v32 = vpack.c.bf16 %v1147_v30, %v1147_v30  ;;  %v1158_v33 = vadd.f32 %v2833_v31, %v3272_v43 }
 0x21e   : > { %v1149_v34 = vpop.f32.mrf.mxu0 }
 0x21f   : > { %1401 = vst [vmem:[%s3280_s19 + $0x4] sm:$0xf] %v2568_v32  ;;  %v2571_v35 = vpack.c.bf16 %v1158_v33, %v1158_v33  ;;  %v1150_v36 = vadd.f32 %v3272_v43, %v1149_v34 }
 0x220   : > { %v2836_v37 = vpop.f32.mrf.mxu0 }
 0x221   : > { %1404 = vst [vmem:[%s3280_s19 + $0x34] sm:$0xf] %v2571_v35  ;;  %v2569_v40 = vpack.c.bf16 %v1150_v36, %v1150_v36  ;;  %v1171_v41 = vadd.f32 %v2836_v37, %v3272_v43 }
 0x222   : > { %v1162_v42 = vpop.f32.mrf.mxu0 }
 0x223   : > { %1402 = vst [vmem:[%s3280_s19 + $0x14] sm:$0xf] %v2569_v40  ;;  %v2574_v44 = vpack.c.bf16 %v1171_v41, %v1171_v41  ;;  %v1163_v45 = vadd.f32 %v3272_v43, %v1162_v42 }
 0x224   : > { %v2837_v46 = vpop.f32.mrf.mxu0 }
 0x225   : > { %1407 = vst [vmem:[%s3280_s19 + $0x64] sm:$0xf] %v2574_v44  ;;  %v2572_v47 = vpack.c.bf16 %v1163_v45, %v1163_v45  ;;  %v1174_v48 = vadd.f32 %v2837_v46, %v3272_v43 }
 0x226   : > { %v1165_v49 = vpop.f32.mrf.mxu0 }
 0x227   : > { %1405 = vst [vmem:[%s3280_s19 + $0x44] sm:$0xf] %v2572_v47  ;;  %v2575_v50 = vpack.c.bf16 %v1174_v48, %v1174_v48  ;;  %v1166_v51 = vadd.f32 %v3272_v43, %v1165_v49 }
 0x228   : > { %v2840_v52 = vpop.f32.mrf.mxu0 }
 0x229   : > { %1408 = vst [vmem:[%s3280_s19 + $0x74] sm:$0xf] %v2575_v50  ;;  %v2573_v53 = vpack.c.bf16 %v1166_v51, %v1166_v51  ;;  %v1187_v54 = vadd.f32 %v2840_v52, %v3272_v43 }
 0x22a   : > { %v1178_v55 = vpop.f32.mrf.mxu0 }
 0x22b   : > { %1406 = vst [vmem:[%s3280_s19 + $0x54] sm:$0xf] %v2573_v53  ;;  %v2578_v57 = vpack.c.bf16 %v1187_v54, %v1187_v54  ;;  %v1179_v59 = vadd.f32 %v3272_v43, %v1178_v55 }
 0x22c   : > { %v2841_v60 = vpop.f32.mrf.mxu0 }
 0x22d   : > { %1411 = vst [vmem:[%s3280_s19 + $0xa4] sm:$0xf] %v2578_v57  ;;  %v2576_v61 = vpack.c.bf16 %v1179_v59, %v1179_v59  ;;  %v1190_v62 = vadd.f32 %v2841_v60, %v3272_v43 }
 0x22e   : > { %v1181_v63 = vpop.f32.mrf.mxu0 }
 0x22f   : > { %1409 = vst [vmem:[%s3280_s19 + $0x84] sm:$0xf] %v2576_v61  ;;  %v2579_v0 = vpack.c.bf16 %v1190_v62, %v1190_v62  ;;  %v1182_v1 = vadd.f32 %v3272_v43, %v1181_v63 }
 0x230   : > { %v2844_v2 = vpop.f32.mrf.mxu0 }
 0x231   : > { %1412 = vst [vmem:[%s3280_s19 + $0xb4] sm:$0xf] %v2579_v0  ;;  %v2577_v3 = vpack.c.bf16 %v1182_v1, %v1182_v1  ;;  %v1203_v4 = vadd.f32 %v2844_v2, %v3272_v43 }
 0x232   : > { %v1194_v5 = vpop.f32.mrf.mxu0 }
 0x233   : > { %1410 = vst [vmem:[%s3280_s19 + $0x94] sm:$0xf] %v2577_v3  ;;  %v2582_v6 = vpack.c.bf16 %v1203_v4, %v1203_v4  ;;  %v1195_v7 = vadd.f32 %v3272_v43, %v1194_v5 }
 0x234   : > { %v2845_v8 = vpop.f32.mrf.mxu0 }
 0x235   : > { %1415 = vst [vmem:[%s3280_s19 + $0xe4] sm:$0xf] %v2582_v6  ;;  %v2580_v9 = vpack.c.bf16 %v1195_v7, %v1195_v7  ;;  %v1206_v10 = vadd.f32 %v2845_v8, %v3272_v43 }
 0x236   : > { %v1197_v11 = vpop.f32.mrf.mxu0 }
 0x237   : > { %1413 = vst [vmem:[%s3280_s19 + $0xc4] sm:$0xf] %v2580_v9  ;;  %v2583_v22 = vpack.c.bf16 %v1206_v10, %v1206_v10  ;;  %v1198_v38 = vadd.f32 %v3272_v43, %v1197_v11 }
 0x238   : > { %v2848_v39 = vpop.f32.mrf.mxu0 }
 0x239   : > { %1416 = vst [vmem:[%s3280_s19 + $0xf4] sm:$0xf] %v2583_v22  ;;  %v2581_v56 = vpack.c.bf16 %v1198_v38, %v1198_v38  ;;  %v1219_v58 = vadd.f32 %v2848_v39, %v3272_v43 }
 0x23a   : > { %v1210_v12 = vpop.f32.mrf.mxu0 }
 0x23b   : > { %1414 = vst [vmem:[%s3280_s19 + $0xd4] sm:$0xf] %v2581_v56  ;;  %v2586_v13 = vpack.c.bf16 %v1219_v58, %v1219_v58  ;;  %v1211_v14 = vadd.f32 %v3272_v43, %v1210_v12 }
 0x23c   : > { %v2849_v18 = vpop.f32.mrf.mxu0 }
 0x23d   : > { %1419 = vst [vmem:[%s3280_s19 + $0x124] sm:$0xf] %v2586_v13  ;;  %v2584_v15 = vpack.c.bf16 %v1211_v14, %v1211_v14  ;;  %v1222_v16 = vadd.f32 %v2849_v18, %v3272_v43 }
 0x23e   : > { %v1213_v19 = vpop.f32.mrf.mxu0 }
 0x23f   : > { %1417 = vst [vmem:[%s3280_s19 + $0x104] sm:$0xf] %v2584_v15  ;;  %v2587_v17 = vpack.c.bf16 %v1222_v16, %v1222_v16  ;;  %v1214_v20 = vadd.f32 %v3272_v43, %v1213_v19 }
 0x240   : > { %v2852_v21 = vpop.f32.mrf.mxu0 }
 0x241   : > { %1420 = vst [vmem:[%s3280_s19 + $0x134] sm:$0xf] %v2587_v17  ;;  %v2585_v23 = vpack.c.bf16 %v1214_v20, %v1214_v20  ;;  %v1235_v24 = vadd.f32 %v2852_v21, %v3272_v43 }
 0x242   : > { %v1226_v25 = vpop.f32.mrf.mxu0 }
 0x243   : > { %1418 = vst [vmem:[%s3280_s19 + $0x114] sm:$0xf] %v2585_v23  ;;  %v2590_v26 = vpack.c.bf16 %v1235_v24, %v1235_v24  ;;  %v1227_v27 = vadd.f32 %v3272_v43, %v1226_v25 }
 0x244   : > { %v2853_v28 = vpop.f32.mrf.mxu0  ;;  %v2868_v29 = vpop.f32.mrf.mxu1 }
 0x245   : > { %1423 = vst [vmem:[%s3280_s19 + $0x164] sm:$0xf] %v2590_v26  ;;  %v2588_v30 = vpack.c.bf16 %v1227_v27, %v1227_v27  ;;  %v1238_v31 = vadd.f32 %v2853_v28, %v3272_v43  ;;  %v1556_v32 = vadd.f32 %v2868_v29, %v3272_v43 }
 0x246   : > { %v1229_v33 = vpop.f32.mrf.mxu0  ;;  %v1547_v34 = vpop.f32.mrf.mxu1 }
 0x247   : > { %1421 = vst [vmem:[%s3280_s19 + $0x144] sm:$0xf] %v2588_v30  ;;  %v2591_v35 = vpack.c.bf16 %v1238_v31, %v1238_v31  ;;  %v2602_v36 = vpack.c.bf16 %v1556_v32, %v1556_v32  ;;  %v1230_v37 = vadd.f32 %v3272_v43, %v1229_v33  ;;  %v1548_v40 = vadd.f32 %v3272_v43, %v1547_v34 }
 0x248   : > { %v2856_v41 = vpop.f32.mrf.mxu0  ;;  %v2869_v42 = vpop.f32.mrf.mxu1 }
 0x249   : > { %1424 = vst [vmem:[%s3280_s19 + $0x174] sm:$0xf] %v2591_v35  ;;  %1804 = vst [vmem:[%s3280_s19 + $0x28] sm:$0xf] %v2602_v36  ;;  %v2589_v44 = vpack.c.bf16 %v1230_v37, %v1230_v37  ;;  %v2600_v45 = vpack.c.bf16 %v1548_v40, %v1548_v40  ;;  %v1251_v46 = vadd.f32 %v2856_v41, %v3272_v43 }
 0x24a   : > { %v1559_v47 = vadd.f32 %v2869_v42, %v3272_v43  ;;  %v1242_v48 = vpop.f32.mrf.mxu0  ;;  %v1550_v49 = vpop.f32.mrf.mxu1 }
 0x24b   : > { %1422 = vst [vmem:[%s3280_s19 + $0x154] sm:$0xf] %v2589_v44  ;;  %1802 = vst [vmem:[%s3280_s19 + $0x8] sm:$0xf] %v2600_v45  ;;  %v2594_v50 = vpack.c.bf16 %v1251_v46, %v1251_v46  ;;  %v1243_v52 = vadd.f32 %v3272_v43, %v1242_v48  ;;  %v1551_v53 = vadd.f32 %v3272_v43, %v1550_v49 }
 0x24c   : > { %v2603_v51 = vpack.c.bf16 %v1559_v47, %v1559_v47  ;;  %v2857_v54 = vpop.f32.mrf.mxu0  ;;  %v2872_v55 = vpop.f32.mrf.mxu1 }
 0x24d   : > { %1427 = vst [vmem:[%s3280_s19 + $0x1a4] sm:$0xf] %v2594_v50  ;;  %v2592_v57 = vpack.c.bf16 %v1243_v52, %v1243_v52  ;;  %v2601_v59 = vpack.c.bf16 %v1551_v53, %v1551_v53  ;;  %v1254_v60 = vadd.f32 %v2857_v54, %v3272_v43  ;;  %v1572_v61 = vadd.f32 %v2872_v55, %v3272_v43 }
 0x24e   : > { %1805 = vst [vmem:[%s3280_s19 + $0x38] sm:$0xf] %v2603_v51  ;;  %v1245_v62 = vpop.f32.mrf.mxu0  ;;  %v1563_v63 = vpop.f32.mrf.mxu1 }
 0x24f   : > { %1425 = vst [vmem:[%s3280_s19 + $0x184] sm:$0xf] %v2592_v57  ;;  %1803 = vst [vmem:[%s3280_s19 + $0x18] sm:$0xf] %v2601_v59  ;;  %v2595_v0 = vpack.c.bf16 %v1254_v60, %v1254_v60  ;;  %v2606_v1 = vpack.c.bf16 %v1572_v61, %v1572_v61  ;;  %v1246_v2 = vadd.f32 %v3272_v43, %v1245_v62 }
 0x250   : > { %v1564_v3 = vadd.f32 %v3272_v43, %v1563_v63  ;;  %v2860_v4 = vpop.f32.mrf.mxu0  ;;  %v2873_v5 = vpop.f32.mrf.mxu1 }
 0x251   : > { %1428 = vst [vmem:[%s3280_s19 + $0x1b4] sm:$0xf] %v2595_v0  ;;  %1808 = vst [vmem:[%s3280_s19 + $0x68] sm:$0xf] %v2606_v1  ;;  %v2593_v6 = vpack.c.bf16 %v1246_v2, %v1246_v2  ;;  %v1267_v8 = vadd.f32 %v2860_v4, %v3272_v43  ;;  %v1575_v9 = vadd.f32 %v2873_v5, %v3272_v43 }
 0x252   : > { %v2604_v7 = vpack.c.bf16 %v1564_v3, %v1564_v3  ;;  %v1258_v10 = vpop.f32.mrf.mxu0  ;;  %v1566_v11 = vpop.f32.mrf.mxu1 }
 0x253   : > { %1426 = vst [vmem:[%s3280_s19 + $0x194] sm:$0xf] %v2593_v6  ;;  %v2598_v22 = vpack.c.bf16 %v1267_v8, %v1267_v8  ;;  %v2607_v38 = vpack.c.bf16 %v1575_v9, %v1575_v9  ;;  %v1259_v39 = vadd.f32 %v3272_v43, %v1258_v10  ;;  %v1567_v56 = vadd.f32 %v3272_v43, %v1566_v11 }
 0x254   : > { %1806 = vst [vmem:[%s3280_s19 + $0x48] sm:$0xf] %v2604_v7  ;;  %v2861_v58 = vpop.f32.mrf.mxu0  ;;  %v2876_v12 = vpop.f32.mrf.mxu1 }
 0x255   : > { %1431 = vst [vmem:[%s3280_s19 + $0x1e4] sm:$0xf] %v2598_v22  ;;  %1809 = vst [vmem:[%s3280_s19 + $0x78] sm:$0xf] %v2607_v38  ;;  %v2596_v13 = vpack.c.bf16 %v1259_v39, %v1259_v39  ;;  %v2605_v14 = vpack.c.bf16 %v1567_v56, %v1567_v56  ;;  %v1270_v18 = vadd.f32 %v2861_v58, %v3272_v43 }
 0x256   : > { %v1588_v15 = vadd.f32 %v2876_v12, %v3272_v43  ;;  %v1261_v16 = vpop.f32.mrf.mxu0  ;;  %v1579_v19 = vpop.f32.mrf.mxu1 }
 0x257   : > { %1429 = vst [vmem:[%s3280_s19 + $0x1c4] sm:$0xf] %v2596_v13  ;;  %1807 = vst [vmem:[%s3280_s19 + $0x58] sm:$0xf] %v2605_v14  ;;  %v2599_v17 = vpack.c.bf16 %v1270_v18, %v1270_v18  ;;  %v1262_v21 = vadd.f32 %v3272_v43, %v1261_v16  ;;  %v1580_v23 = vadd.f32 %v3272_v43, %v1579_v19 }
 0x258   : > { %v2610_v20 = vpack.c.bf16 %v1588_v15, %v1588_v15  ;;  %v2877_v24 = vpop.f32.mrf.mxu1  ;;  %v2904_v25 = vpop.f32.mrf.mxu0 }
 0x259   : > { %1432 = vst [vmem:[%s3280_s19 + $0x1f4] sm:$0xf] %v2599_v17  ;;  %v2597_v26 = vpack.c.bf16 %v1262_v21, %v1262_v21  ;;  %v2608_v27 = vpack.c.bf16 %v1580_v23, %v1580_v23  ;;  %v1591_v28 = vadd.f32 %v2877_v24, %v3272_v43  ;;  %v1957_v29 = vadd.f32 %v2904_v25, %v3272_v43 }
 0x25a   : > { %1812 = vst [vmem:[%s3280_s19 + $0xa8] sm:$0xf] %v2610_v20  ;;  %v1582_v30 = vpop.f32.mrf.mxu1  ;;  %v1948_v31 = vpop.f32.mrf.mxu0 }
 0x25b   : > { %1430 = vst [vmem:[%s3280_s19 + $0x1d4] sm:$0xf] %v2597_v26  ;;  %1810 = vst [vmem:[%s3280_s19 + $0x88] sm:$0xf] %v2608_v27  ;;  %v2611_v32 = vpack.c.bf16 %v1591_v28, %v1591_v28  ;;  %v2634_v33 = vpack.c.bf16 %v1957_v29, %v1957_v29  ;;  %v1583_v34 = vadd.f32 %v3272_v43, %v1582_v30 }
 0x25c   : > { %v1949_v35 = vadd.f32 %v3272_v43, %v1948_v31  ;;  %v2880_v36 = vpop.f32.mrf.mxu1  ;;  %v2905_v37 = vpop.f32.mrf.mxu0 }
 0x25d   : > { %1813 = vst [vmem:[%s3280_s19 + $0xb8] sm:$0xf] %v2611_v32  ;;  %2205 = vst [vmem:[%s3280_s19 + $0x2c] sm:$0xf] %v2634_v33  ;;  %v2609_v40 = vpack.c.bf16 %v1583_v34, %v1583_v34  ;;  %v1604_v42 = vadd.f32 %v2880_v36, %v3272_v43  ;;  %v1960_v44 = vadd.f32 %v2905_v37, %v3272_v43 }
 0x25e   : > { %v2632_v41 = vpack.c.bf16 %v1949_v35, %v1949_v35  ;;  %v1595_v45 = vpop.f32.mrf.mxu1  ;;  %v1951_v46 = vpop.f32.mrf.mxu0 }
 0x25f   : > { %1811 = vst [vmem:[%s3280_s19 + $0x98] sm:$0xf] %v2609_v40  ;;  %v2614_v47 = vpack.c.bf16 %v1604_v42, %v1604_v42  ;;  %v2635_v48 = vpack.c.bf16 %v1960_v44, %v1960_v44  ;;  %v1596_v49 = vadd.f32 %v3272_v43, %v1595_v45  ;;  %v1952_v50 = vadd.f32 %v3272_v43, %v1951_v46 }
 0x260   : > { %2203 = vst [vmem:[%s3280_s19 + $0xc] sm:$0xf] %v2632_v41  ;;  %v2881_v51 = vpop.f32.mrf.mxu1  ;;  %v2908_v52 = vpop.f32.mrf.mxu0 }
 0x261   : > { %1816 = vst [vmem:[%s3280_s19 + $0xe8] sm:$0xf] %v2614_v47  ;;  %2206 = vst [vmem:[%s3280_s19 + $0x3c] sm:$0xf] %v2635_v48  ;;  %v2612_v53 = vpack.c.bf16 %v1596_v49, %v1596_v49  ;;  %v2633_v54 = vpack.c.bf16 %v1952_v50, %v1952_v50  ;;  %v1607_v55 = vadd.f32 %v2881_v51, %v3272_v43 }
 0x262   : > { %v1973_v57 = vadd.f32 %v2908_v52, %v3272_v43  ;;  %v1598_v59 = vpop.f32.mrf.mxu1  ;;  %v1964_v60 = vpop.f32.mrf.mxu0 }
 0x263   : > { %1814 = vst [vmem:[%s3280_s19 + $0xc8] sm:$0xf] %v2612_v53  ;;  %2204 = vst [vmem:[%s3280_s19 + $0x1c] sm:$0xf] %v2633_v54  ;;  %v2615_v61 = vpack.c.bf16 %v1607_v55, %v1607_v55  ;;  %v1599_v63 = vadd.f32 %v3272_v43, %v1598_v59  ;;  %v1965_v0 = vadd.f32 %v3272_v43, %v1964_v60 }
 0x264   : > { %v2638_v62 = vpack.c.bf16 %v1973_v57, %v1973_v57  ;;  %v2884_v1 = vpop.f32.mrf.mxu1  ;;  %v2909_v2 = vpop.f32.mrf.mxu0 }
 0x265   : > { %1817 = vst [vmem:[%s3280_s19 + $0xf8] sm:$0xf] %v2615_v61  ;;  %v2613_v3 = vpack.c.bf16 %v1599_v63, %v1599_v63  ;;  %v2636_v4 = vpack.c.bf16 %v1965_v0, %v1965_v0  ;;  %v1620_v5 = vadd.f32 %v2884_v1, %v3272_v43  ;;  %v1976_v6 = vadd.f32 %v2909_v2, %v3272_v43 }
 0x266   : > { %2209 = vst [vmem:[%s3280_s19 + $0x6c] sm:$0xf] %v2638_v62  ;;  %v1611_v7 = vpop.f32.mrf.mxu1  ;;  %v1967_v8 = vpop.f32.mrf.mxu0 }
 0x267   : > { %1815 = vst [vmem:[%s3280_s19 + $0xd8] sm:$0xf] %v2613_v3  ;;  %2207 = vst [vmem:[%s3280_s19 + $0x4c] sm:$0xf] %v2636_v4  ;;  %v2618_v9 = vpack.c.bf16 %v1620_v5, %v1620_v5  ;;  %v2639_v10 = vpack.c.bf16 %v1976_v6, %v1976_v6  ;;  %v1612_v11 = vadd.f32 %v3272_v43, %v1611_v7 }
 0x268   : > { %v1968_v22 = vadd.f32 %v3272_v43, %v1967_v8  ;;  %v2885_v38 = vpop.f32.mrf.mxu1  ;;  %v2912_v39 = vpop.f32.mrf.mxu0 }
 0x269   : > { %1820 = vst [vmem:[%s3280_s19 + $0x128] sm:$0xf] %v2618_v9  ;;  %2210 = vst [vmem:[%s3280_s19 + $0x7c] sm:$0xf] %v2639_v10  ;;  %v2616_v56 = vpack.c.bf16 %v1612_v11, %v1612_v11  ;;  %v1623_v12 = vadd.f32 %v2885_v38, %v3272_v43  ;;  %v1989_v13 = vadd.f32 %v2912_v39, %v3272_v43 }
 0x26a   : > { %v2637_v58 = vpack.c.bf16 %v1968_v22, %v1968_v22  ;;  %v1614_v14 = vpop.f32.mrf.mxu1  ;;  %v1980_v18 = vpop.f32.mrf.mxu0 }
 0x26b   : > { %1818 = vst [vmem:[%s3280_s19 + $0x108] sm:$0xf] %v2616_v56  ;;  %v2619_v15 = vpack.c.bf16 %v1623_v12, %v1623_v12  ;;  %v2642_v16 = vpack.c.bf16 %v1989_v13, %v1989_v13  ;;  %v1615_v19 = vadd.f32 %v3272_v43, %v1614_v14  ;;  %v1981_v17 = vadd.f32 %v3272_v43, %v1980_v18 }
 0x26c   : > { %2208 = vst [vmem:[%s3280_s19 + $0x5c] sm:$0xf] %v2637_v58  ;;  %v2888_v20 = vpop.f32.mrf.mxu1  ;;  %v2913_v21 = vpop.f32.mrf.mxu0 }
 0x26d   : > { %1821 = vst [vmem:[%s3280_s19 + $0x138] sm:$0xf] %v2619_v15  ;;  %2213 = vst [vmem:[%s3280_s19 + $0xac] sm:$0xf] %v2642_v16  ;;  %v2617_v23 = vpack.c.bf16 %v1615_v19, %v1615_v19  ;;  %v2640_v24 = vpack.c.bf16 %v1981_v17, %v1981_v17  ;;  %v1636_v25 = vadd.f32 %v2888_v20, %v3272_v43 }
 0x26e   : > { %v1992_v26 = vadd.f32 %v2913_v21, %v3272_v43  ;;  %v1627_v27 = vpop.f32.mrf.mxu1  ;;  %v1983_v28 = vpop.f32.mrf.mxu0 }
 0x26f   : > { %1819 = vst [vmem:[%s3280_s19 + $0x118] sm:$0xf] %v2617_v23  ;;  %2211 = vst [vmem:[%s3280_s19 + $0x8c] sm:$0xf] %v2640_v24  ;;  %v2622_v29 = vpack.c.bf16 %v1636_v25, %v1636_v25  ;;  %v1628_v31 = vadd.f32 %v3272_v43, %v1627_v27  ;;  %v1984_v32 = vadd.f32 %v3272_v43, %v1983_v28 }
 0x270   : > { %v2643_v30 = vpack.c.bf16 %v1992_v26, %v1992_v26  ;;  %v2889_v33 = vpop.f32.mrf.mxu1  ;;  %v2916_v34 = vpop.f32.mrf.mxu0 }
 0x271   : > { %1824 = vst [vmem:[%s3280_s19 + $0x168] sm:$0xf] %v2622_v29  ;;  %v2620_v35 = vpack.c.bf16 %v1628_v31, %v1628_v31  ;;  %v2641_v36 = vpack.c.bf16 %v1984_v32, %v1984_v32  ;;  %v1639_v37 = vadd.f32 %v2889_v33, %v3272_v43  ;;  %v2005_v40 = vadd.f32 %v2916_v34, %v3272_v43 }
 0x272   : > { %2214 = vst [vmem:[%s3280_s19 + $0xbc] sm:$0xf] %v2643_v30  ;;  %v1630_v41 = vpop.f32.mrf.mxu1  ;;  %v1996_v42 = vpop.f32.mrf.mxu0 }
 0x273   : > { %1822 = vst [vmem:[%s3280_s19 + $0x148] sm:$0xf] %v2620_v35  ;;  %2212 = vst [vmem:[%s3280_s19 + $0x9c] sm:$0xf] %v2641_v36  ;;  %v2623_v44 = vpack.c.bf16 %v1639_v37, %v1639_v37  ;;  %v2646_v45 = vpack.c.bf16 %v2005_v40, %v2005_v40  ;;  %v1631_v46 = vadd.f32 %v3272_v43, %v1630_v41  ;;  %v2969_v36 = vld [vmem:[%s3556_s4] ss:$0 sm:$0xff] }
 0x274   : > { %v1997_v47 = vadd.f32 %v3272_v43, %v1996_v42  ;;  %v2892_v48 = vpop.f32.mrf.mxu1  ;;  %v2917_v49 = vpop.f32.mrf.mxu0 }
 0x275   : > { %1825 = vst [vmem:[%s3280_s19 + $0x178] sm:$0xf] %v2623_v44  ;;  %2217 = vst [vmem:[%s3280_s19 + $0xec] sm:$0xf] %v2646_v45  ;;  %v2621_v50 = vpack.c.bf16 %v1631_v46, %v1631_v46  ;;  %v1652_v52 = vadd.f32 %v2892_v48, %v3272_v43  ;;  %v2008_v53 = vadd.f32 %v2917_v49, %v3272_v43 }
 0x276   : > { %v2644_v51 = vpack.c.bf16 %v1997_v47, %v1997_v47  ;;  %v1643_v54 = vpop.f32.mrf.mxu1  ;;  %v1999_v55 = vpop.f32.mrf.mxu0 }
 0x277   : > { %1823 = vst [vmem:[%s3280_s19 + $0x158] sm:$0xf] %v2621_v50  ;;  %v2626_v57 = vpack.c.bf16 %v1652_v52, %v1652_v52  ;;  %v2647_v59 = vpack.c.bf16 %v2008_v53, %v2008_v53  ;;  %v1644_v60 = vadd.f32 %v3272_v43, %v1643_v54  ;;  %v2000_v61 = vadd.f32 %v3272_v43, %v1999_v55 }
 0x278   : > { %2215 = vst [vmem:[%s3280_s19 + $0xcc] sm:$0xf] %v2644_v51  ;;  %v2893_v62 = vpop.f32.mrf.mxu1  ;;  %v2920_v63 = vpop.f32.mrf.mxu0 }
 0x279   : > { %1828 = vst [vmem:[%s3280_s19 + $0x1a8] sm:$0xf] %v2626_v57  ;;  %2218 = vst [vmem:[%s3280_s19 + $0xfc] sm:$0xf] %v2647_v59  ;;  %v2624_v0 = vpack.c.bf16 %v1644_v60, %v1644_v60  ;;  %v2645_v1 = vpack.c.bf16 %v2000_v61, %v2000_v61  ;;  %v1655_v2 = vadd.f32 %v2893_v62, %v3272_v43 }
 0x27a   : > { %v2021_v3 = vadd.f32 %v2920_v63, %v3272_v43  ;;  %v1646_v4 = vpop.f32.mrf.mxu1  ;;  %v2012_v5 = vpop.f32.mrf.mxu0 }
 0x27b   : > { %1826 = vst [vmem:[%s3280_s19 + $0x188] sm:$0xf] %v2624_v0  ;;  %2216 = vst [vmem:[%s3280_s19 + $0xdc] sm:$0xf] %v2645_v1  ;;  %v2627_v6 = vpack.c.bf16 %v1655_v2, %v1655_v2  ;;  %v1647_v8 = vadd.f32 %v3272_v43, %v1646_v4  ;;  %v2013_v9 = vadd.f32 %v3272_v43, %v2012_v5 }
 0x27c   : > { %v2650_v7 = vpack.c.bf16 %v2021_v3, %v2021_v3  ;;  %v2896_v10 = vpop.f32.mrf.mxu1  ;;  %v2921_v11 = vpop.f32.mrf.mxu0 }
 0x27d   : > { %1829 = vst [vmem:[%s3280_s19 + $0x1b8] sm:$0xf] %v2627_v6  ;;  %v2625_v22 = vpack.c.bf16 %v1647_v8, %v1647_v8  ;;  %v2648_v38 = vpack.c.bf16 %v2013_v9, %v2013_v9  ;;  %v1668_v39 = vadd.f32 %v2896_v10, %v3272_v43  ;;  %v2024_v56 = vadd.f32 %v2921_v11, %v3272_v43 }
 0x27e   : > { %2221 = vst [vmem:[%s3280_s19 + $0x12c] sm:$0xf] %v2650_v7  ;;  %v1659_v58 = vpop.f32.mrf.mxu1  ;;  %v2015_v12 = vpop.f32.mrf.mxu0 }
 0x27f   : > { %1827 = vst [vmem:[%s3280_s19 + $0x198] sm:$0xf] %v2625_v22  ;;  %2219 = vst [vmem:[%s3280_s19 + $0x10c] sm:$0xf] %v2648_v38  ;;  %v2630_v13 = vpack.c.bf16 %v1668_v39, %v1668_v39  ;;  %v2651_v14 = vpack.c.bf16 %v2024_v56, %v2024_v56  ;;  %v1660_v18 = vadd.f32 %v3272_v43, %v1659_v58 }
 0x280   : > { %v2016_v15 = vadd.f32 %v3272_v43, %v2015_v12  ;;  %v2897_v16 = vpop.f32.mrf.mxu1  ;;  %v2924_v19 = vpop.f32.mrf.mxu0 }
 0x281   : > { %1832 = vst [vmem:[%s3280_s19 + $0x1e8] sm:$0xf] %v2630_v13  ;;  %2222 = vst [vmem:[%s3280_s19 + $0x13c] sm:$0xf] %v2651_v14  ;;  %v2628_v17 = vpack.c.bf16 %v1660_v18, %v1660_v18  ;;  %v1671_v21 = vadd.f32 %v2897_v16, %v3272_v43  ;;  %v2037_v23 = vadd.f32 %v2924_v19, %v3272_v43 }
 0x282   : > { %v2649_v20 = vpack.c.bf16 %v2016_v15, %v2016_v15  ;;  %v1662_v24 = vpop.f32.mrf.mxu1  ;;  %v2028_v25 = vpop.f32.mrf.mxu0 }
 0x283   : > { %1830 = vst [vmem:[%s3280_s19 + $0x1c8] sm:$0xf] %v2628_v17  ;;  %v2631_v26 = vpack.c.bf16 %v1671_v21, %v1671_v21  ;;  %v2654_v27 = vpack.c.bf16 %v2037_v23, %v2037_v23  ;;  %v1663_v28 = vadd.f32 %v3272_v43, %v1662_v24  ;;  %v2029_v29 = vadd.f32 %v3272_v43, %v2028_v25 }
 0x284   : > { %2220 = vst [vmem:[%s3280_s19 + $0x11c] sm:$0xf] %v2649_v20  ;;  %v2925_v30 = vpop.f32.mrf.mxu0 }
 0x285   : > { %1833 = vst [vmem:[%s3280_s19 + $0x1f8] sm:$0xf] %v2631_v26  ;;  %2225 = vst [vmem:[%s3280_s19 + $0x16c] sm:$0xf] %v2654_v27  ;;  %v2629_v31 = vpack.c.bf16 %v1663_v28, %v1663_v28  ;;  %v2652_v32 = vpack.c.bf16 %v2029_v29, %v2029_v29  ;;  %v2040_v33 = vadd.f32 %v2925_v30, %v3272_v43 }
 0x286   : > { %v2031_v34 = vpop.f32.mrf.mxu0 }
 0x287   : > { %1831 = vst [vmem:[%s3280_s19 + $0x1d8] sm:$0xf] %v2629_v31  ;;  %2223 = vst [vmem:[%s3280_s19 + $0x14c] sm:$0xf] %v2652_v32  ;;  %v2655_v35 = vpack.c.bf16 %v2040_v33, %v2040_v33  ;;  %v2032_v37 = vadd.f32 %v2969_v36, %v2031_v34 }
 0x288   : > { %v2928_v40 = vpop.f32.mrf.mxu0 }
 0x289   : > { %2226 = vst [vmem:[%s3280_s19 + $0x17c] sm:$0xf] %v2655_v35  ;;  %v2653_v41 = vpack.c.bf16 %v2032_v37, %v2032_v37  ;;  %v2053_v42 = vadd.f32 %v2969_v36, %v2928_v40 }
 0x28a   : > { %v2044_v44 = vpop.f32.mrf.mxu0 }
 0x28b   : > { %2224 = vst [vmem:[%s3280_s19 + $0x15c] sm:$0xf] %v2653_v41  ;;  %v2658_v43 = vpack.c.bf16 %v2053_v42, %v2053_v42  ;;  %v2045_v45 = vadd.f32 %v2969_v36, %v2044_v44 }
 0x28c   : > { %v2929_v46 = vpop.f32.mrf.mxu0 }
 0x28d   : > { %2229 = vst [vmem:[%s3280_s19 + $0x1ac] sm:$0xf] %v2658_v43  ;;  %v2656_v47 = vpack.c.bf16 %v2045_v45, %v2045_v45  ;;  %v2056_v48 = vadd.f32 %v2969_v36, %v2929_v46 }
 0x28e   : > { %v2047_v49 = vpop.f32.mrf.mxu0 }
 0x28f   : > { %2227 = vst [vmem:[%s3280_s19 + $0x18c] sm:$0xf] %v2656_v47  ;;  %v2659_v50 = vpack.c.bf16 %v2056_v48, %v2056_v48  ;;  %v2048_v51 = vadd.f32 %v2969_v36, %v2047_v49 }
 0x290   : > { %v2932_v52 = vpop.f32.mrf.mxu0 }
 0x291   : > { %2230 = vst [vmem:[%s3280_s19 + $0x1bc] sm:$0xf] %v2659_v50  ;;  %v2657_v53 = vpack.c.bf16 %v2048_v51, %v2048_v51  ;;  %v2069_v54 = vadd.f32 %v2969_v36, %v2932_v52 }
 0x292   : > { %v2060_v55 = vpop.f32.mrf.mxu0 }
 0x293   : > { %2228 = vst [vmem:[%s3280_s19 + $0x19c] sm:$0xf] %v2657_v53  ;;  %v2662_v57 = vpack.c.bf16 %v2069_v54, %v2069_v54  ;;  %v2061_v59 = vadd.f32 %v2969_v36, %v2060_v55 }
 0x294   : > { %v2933_v60 = vpop.f32.mrf.mxu0 }
 0x295   : > { %2233 = vst [vmem:[%s3280_s19 + $0x1ec] sm:$0xf] %v2662_v57  ;;  %v2660_v61 = vpack.c.bf16 %v2061_v59, %v2061_v59  ;;  %v2072_v62 = vadd.f32 %v2969_v36, %v2933_v60 }
 0x296   : > { %v2063_v63 = vpop.f32.mrf.mxu0 }
 0x297   : > { %2231 = vst [vmem:[%s3280_s19 + $0x1cc] sm:$0xf] %v2660_v61  ;;  %v2663_v0 = vpack.c.bf16 %v2072_v62, %v2072_v62  ;;  %v2064_v1 = vadd.f32 %v2969_v36, %v2063_v63 }
 0x299   : > { %2234 = vst [vmem:[%s3280_s19 + $0x1fc] sm:$0xf] %v2663_v0  ;;  %v2661_v2 = vpack.c.bf16 %v2064_v1, %v2064_v1 }
 0x29b   : > { %2232 = vst [vmem:[%s3280_s19 + $0x1dc] sm:$0xf] %v2661_v2 }
 0x29c PF: > { %s15_s18 = sadd.s32 1, %s2976_s18  }
 0x29d   : > { %p12_p4 = scmp.ge.s32.totalorder %s15_s18, 4  }
 0x29f   :  { %14 = sbr.rel (!%p12_p4) target bundleno = 1 (0x1), region = 70 }

</bundles_post_ra>
